<compile_context>
chip_gen: v7x
topology: tpu7x:2x2x1
jax: 0.10.0
libtpu: 0.0.40
codegen_flags: <defaults>
</compile_context>

<pallas_src>
import jax
import jax.numpy as jnp
import numpy as np
from jax import lax
from jax.experimental import pallas as pl
from jax.experimental.pallas import tpu as pltpu


# ---------------------------------------------------------------------------
# helpers
# ---------------------------------------------------------------------------
def _pick_q_tile(n):
    """Query-block size: whole N if small, else largest nice divisor <= 512."""
    if n <= 512:
        return n
    for t in (512, 256, 128, 64, 32, 16, 8):
        if n % t == 0:
            return t
    # TODO(synk): N not a multiple of 8 falls back to a single (N,N) block.
    return n


def _pick_rows_tile(bn):
    """Row-tile for the memory-bound BN-apply kernel (cap raised to 2048)."""
    if bn <= 2048:
        return bn
    for t in (2048, 1024, 512, 256, 128, 64, 32, 16, 8):
        if bn % t == 0:
            return t
    return bn


def _vmem_limit(per_call_bytes):
    """Generation-aware scoped-VMEM request: physical capacity minus headroom."""
    try:
        cap = int(pltpu.get_tpu_info().vmem_capacity_bytes)
    except Exception:
        cap = 64 * 2**20                      # conservative (v7x physical)
    cap = (cap * 7) // 8                      # ~56 MiB on v7x, ~112 MiB on v5e/v6e
    want = int(1.25 * per_call_bytes) + (2 << 20)   # + Mosaic-internal allowance
    return int(min(cap, max(32 << 20, want)))


# ---------------------------------------------------------------------------
# Kernel 2: BatchNorm apply (precomputed scale/shift) + ReLU + residual.
# ---------------------------------------------------------------------------
def bn_apply_kernel(x_ref, t_ref, scale_ref, shift_ref, o_ref):
    y = t_ref[...].astype(jnp.float32) * scale_ref[...] + shift_ref[...]
    o_ref[...] = x_ref[...] + jnp.maximum(y, 0.0)


# ---------------------------------------------------------------------------
# Forward pass
# ---------------------------------------------------------------------------
def sa_layer_single_head(x_bnc, params):
    """Forward pass of SA_Layer_Single_Head.  x_bnc: (B, N, C) float32."""
    wq, wk, wv, bv, wt, bt, gamma, beta = params
    del wv, bv, bt                # x_v is dead code in forward; bt cancels vs BN mean
    B, N, C = x_bnc.shape

    # Tiny (C, C) weight prep (fused Wq^T @ Wk); no whole-tensor HBM passes.
    wqk = jnp.dot(wq.T, wk).astype(jnp.bfloat16)          # (C, C)
    wt_b = wt.astype(jnp.bfloat16)                        # (C, C), used as Wt @ d^T

    tq = _pick_q_tile(N)
    n_i = max(N // tq, 1)
    nf = float(N)

    # --- Kernel 1: per-batch attention, query-block tiled --------------------
    def attn_kernel(x_ref, wqk_ref, wt_ref, t_ref, s1_ref, s2_ref,
                    xt_scr, xr_acc, cs_acc):
        i = pl.program_id(1)

        @pl.when(i == 0)
        def _init():
            # one O(N*C) transpose per batch, cached in bf16 for the energy rhs
            xt_scr[...] = jnp.transpose(x_ref[0]).astype(jnp.bfloat16)   # (C, N)
            xr_acc[...] = jnp.zeros_like(xr_acc)
            cs_acc[...] = jnp.zeros_like(cs_acc)

        off = pl.multiple_of(i * tq, tq)
        xi32 = x_ref[0, pl.ds(off, tq), :]                 # (tq, C) f32
        xi = xi32.astype(jnp.bfloat16)

        # fused q/k projection + energy (canonical MXU orientation, bf16 operands)
        xqk = jnp.dot(xi, wqk_ref[...], preferred_element_type=jnp.float32)
        energy = jnp.dot(xqk.astype(jnp.bfloat16), xt_scr[...],
                         preferred_element_type=jnp.float32)             # (tq, N)

        # row softmax (dim=-1) kept un-normalized; bf16 exp (EUP fast path).
        e = energy - jnp.max(energy, axis=-1, keepdims=True)
        p = jnp.exp(e.astype(jnp.bfloat16))                              # (tq, N) bf16
        rowsum = jnp.sum(p.astype(jnp.float32), axis=-1, keepdims=True)  # (tq, 1)
        r = 1.0 / rowsum                                                 # exact recip
        r_row = jnp.transpose(r)                                         # (1, tq)

        # rank-1 normalization folding (attention never materialized)
        cs_acc[...] += jnp.dot(r_row.astype(jnp.bfloat16), p,
                               preferred_element_type=jnp.float32)       # (1, N)
        sxT = jnp.transpose(xi32 * r).astype(jnp.bfloat16)               # (C, tq)
        xr_acc[...] += jnp.dot(sxT, p,
                               preferred_element_type=jnp.float32)       # (C, N)

        @pl.when(i == n_i - 1)
        def _finish():
            c_row = 1.0 / (1e-6 + cs_acc[...])                           # (1, N)
            x_rT = xr_acc[...] * c_row                                   # (C, N)
            dT = jnp.transpose(x_ref[0]) - x_rT                          # (C, N) f32
            # trans_conv (1x1 conv == channel matmul); bias cancelled by BN.
            tT = jnp.dot(wt_ref[...], dT.astype(jnp.bfloat16),
                         preferred_element_type=jnp.float32)             # (C, N)
            t_nc = jnp.transpose(tT)                                     # (N, C) f32
            s1v = jnp.sum(t_nc, axis=0, keepdims=True)                   # (1, C)
            mu = s1v * (1.0 / nf)
            tc = t_nc - mu
            s1_ref[0] = s1v                                              # per-batch sum
            s2_ref[0] = jnp.sum(tc * tc, axis=0, keepdims=True)          # centered SSQ
            t_ref[0] = t_nc.astype(t_ref.dtype)                          # bf16 writeback

    f32b, bf16b = 4, 2
    est1 = (2 * N * C * f32b                    # x block (double-buffered)
            + 2 * N * C * bf16b                 # t output block
            + 8 * C * f32b                      # s1/s2 blocks
            + 2 * 2 * C * C * bf16b             # wqk/wt (constant index -> one DMA)
            + C * N * (bf16b + f32b) + N * f32b # persistent scratch
            + tq * N * (f32b + 2 * bf16b + f32b)   # energy, e/p bf16, p f32 copy
            + 8 * tq * C * f32b                 # per-step small temporaries
            + 5 * C * N * f32b)                 # last-step temporaries

    t_bf, s1, s2 = pl.pallas_call(
        attn_kernel,
        out_shape=(
            jax.ShapeDtypeStruct((B, N, C), jnp.bfloat16),
            jax.ShapeDtypeStruct((B, 1, C), jnp.float32),
            jax.ShapeDtypeStruct((B, 1, C), jnp.float32),
        ),
        grid_spec=pltpu.PrefetchScalarGridSpec(
            num_scalar_prefetch=0,
            grid=(B, n_i),
            in_specs=[
                pl.BlockSpec((1, N, C), lambda b, i: (b, 0, 0)),
                pl.BlockSpec((C, C), lambda b, i: (0, 0)),
                pl.BlockSpec((C, C), lambda b, i: (0, 0)),
            ],
            out_specs=[
                pl.BlockSpec((1, N, C), lambda b, i: (b, 0, 0)),
                pl.BlockSpec((1, 1, C), lambda b, i: (b, 0, 0)),
                pl.BlockSpec((1, 1, C), lambda b, i: (b, 0, 0)),
            ],
            scratch_shapes=[
                pltpu.VMEM((C, N), jnp.bfloat16),   # cached x^T
                pltpu.VMEM((C, N), jnp.float32),    # x_r accumulator
                pltpu.VMEM((1, N), jnp.float32),    # column-sum accumulator
            ],
        ),
        compiler_params=pltpu.CompilerParams(
            dimension_semantics=("parallel", "arbitrary"),
            vmem_limit_bytes=_vmem_limit(est1),
        ),
    )(x_bnc, wqk, wt_b)

    # --- train-mode BatchNorm1d statistics (pooled, centered combine) --------
    mean_b = s1[:, 0, :] / jnp.float32(N)                                # (B, C)
    mean = jnp.mean(mean_b, axis=0, keepdims=True)                       # (1, C)
    ssq = (jnp.sum(s2[:, 0, :], axis=0, keepdims=True)
           + jnp.float32(N) * jnp.sum((mean_b - mean) ** 2, axis=0, keepdims=True))
    var = ssq / jnp.float32(B * N)                                       # biased var
    inv = gamma[None, :] * lax.rsqrt(var + 1e-5)                         # (1, C)
    scale = inv
    shift = beta[None, :] - mean * inv

    # --- Kernel 2: tiled BN apply + ReLU + residual (B*N folded) ------------
    rows = B * N
    tr = _pick_rows_tile(rows)
    x2 = x_bnc.reshape(rows, C)
    t2 = t_bf.reshape(rows, C)
    est2 = 2 * tr * C * (4 + 2 + 4) + 4 * C * 4

    out2 = pl.pallas_call(
        bn_apply_kernel,
        out_shape=jax.ShapeDtypeStruct((rows, C), jnp.float32),
        grid_spec=pltpu.PrefetchScalarGridSpec(
            num_scalar_prefetch=0,
            grid=(rows // tr,),
            in_specs=[
                pl.BlockSpec((tr, C), lambda r: (r, 0)),
                pl.BlockSpec((tr, C), lambda r: (r, 0)),
                pl.BlockSpec((1, C), lambda r: (0, 0)),
                pl.BlockSpec((1, C), lambda r: (0, 0)),
            ],
            out_specs=pl.BlockSpec((tr, C), lambda r: (r, 0)),
        ),
        compiler_params=pltpu.CompilerParams(
            dimension_semantics=("parallel",),
            vmem_limit_bytes=_vmem_limit(est2),
        ),
    )(x2, t2, scale, shift)

    return out2.reshape(B, N, C)


# ---------------------------------------------------------------------------
# Pure-JAX mirror of the PyTorch forward (train-mode BN, bias kept).
# ---------------------------------------------------------------------------
def reference(x_bnc, params):
    wq, wk, wv, bv, wt, bt, gamma, beta = params
    del wv, bv                                           # x_v is dead in forward
    x = jnp.transpose(x_bnc, (0, 2, 1))                  # (B, C, N)
    xq = jnp.einsum("oc,bcn->bno", wq, x)                # (B, N, C//4)
    xk = jnp.einsum("oc,bcn->bon", wk, x)                # (B, C//4, N)
    energy = jnp.einsum("bno,bom->bnm", xq, xk)          # (B, N, N)
    attn = jax.nn.softmax(energy, axis=-1)
    attn = attn / (1e-6 + attn.sum(axis=1, keepdims=True))
    x_r = jnp.einsum("bcn,bnm->bcm", x, attn)
    d = x - x_r
    t = jnp.einsum("oc,bcn->bon", wt, d) + bt[None, :, None]
    mean = t.mean(axis=(0, 2), keepdims=True)
    var = ((t - mean) ** 2).mean(axis=(0, 2), keepdims=True)
    y = gamma[None, :, None] * (t - mean) * lax.rsqrt(var + 1e-5) + beta[None, :, None]
    out = x + jnp.maximum(y, 0.0)
    return jnp.transpose(out, (0, 2, 1))                 # (B, N, C)


if __name__ == "__main__":
    # Small but lane-dense demo shapes (N, C multiples of 128).
    B, N, C = 2, 128, 128
    C4 = C // 4
    w_scale = C ** -0.5

    key = jax.random.PRNGKey(0)
    ks = jax.random.split(key, 9)
    wq = jax.random.normal(ks[0], (C4, C), jnp.float32) * w_scale   # q_conv.weight
    wk = jax.random.normal(ks[1], (C4, C), jnp.float32) * w_scale   # k_conv.weight
    wv = jax.random.normal(ks[2], (C, C), jnp.float32) * w_scale    # v_conv.weight (dead)
    bv = jax.random.normal(ks[3], (C,), jnp.float32) * 0.05         # v_conv.bias   (dead)
    wt = jax.random.normal(ks[4], (C, C), jnp.float32) * w_scale    # trans_conv.weight
    bt = jax.random.normal(ks[5], (C,), jnp.float32) * 0.05         # trans_conv.bias
    gamma = 1.0 + 0.1 * jax.random.normal(ks[6], (C,), jnp.float32) # after_norm.weight
    beta = 0.1 * jax.random.normal(ks[7], (C,), jnp.float32)        # after_norm.bias
    params = (wq, wk, wv, bv, wt, bt, gamma, beta)
    x = jax.random.normal(ks[8], (B, N, C), jnp.float32)

    fwd = jax.jit(sa_layer_single_head)
    out = jax.block_until_ready(fwd(x, params))
    assert out.shape == (B, N, C)

    ref = jax.block_until_ready(reference(x, params))
    # bf16 MXU operands (mandated by the perf review) set the error floor:
    # ~0.4% relative logit error amplified through softmax / BN.
    np.testing.assert_allclose(np.asarray(out), np.asarray(ref), rtol=1e-1, atol=1e-1)

    print("KERNEL_OK")
</pallas_src>

<mosaic_0001>
module attributes {stable_mosaic.version = 11 : i64} {
  func.func @attn_kernel(%arg0: i32, %arg1: i32, %arg2: memref<1x128x128xf32, #tpu.memory_space<vmem>>, %arg3: memref<128x128xbf16, #tpu.memory_space<vmem>>, %arg4: memref<128x128xbf16, #tpu.memory_space<vmem>>, %arg5: memref<1x128x128xbf16, #tpu.memory_space<vmem>>, %arg6: memref<1x1x128xf32, #tpu.memory_space<vmem>>, %arg7: memref<1x1x128xf32, #tpu.memory_space<vmem>>, %arg8: memref<128x128xbf16, #tpu.memory_space<vmem>>, %arg9: memref<128x128xf32, #tpu.memory_space<vmem>>, %arg10: memref<1x128xf32, #tpu.memory_space<vmem>>) attributes {dimension_semantics = [#tpu.dimension_semantics<parallel>, #tpu.dimension_semantics<arbitrary>], iteration_bounds = array<i64: 2, 1>, scalar_prefetch = 0 : i64, scratch_operands = 3 : i64, tpu.core_type = #tpu.core_type<tc>, window_params = [{transform_indices = @transform_0, window_bounds = array<i64: 1, 128, 128>}, {pipeline_mode = #tpu.pipeline_mode<synchronous>, transform_indices = @transform_1, window_bounds = array<i64: 128, 128>}, {pipeline_mode = #tpu.pipeline_mode<synchronous>, transform_indices = @transform_2, window_bounds = array<i64: 128, 128>}, {transform_indices = @transform_3, window_bounds = array<i64: 1, 128, 128>}, {transform_indices = @transform_4, window_bounds = array<i64: 1, 1, 128>}, {transform_indices = @transform_5, window_bounds = array<i64: 1, 1, 128>}]} {
    %c0_i32 = arith.constant 0 : i32
    %0 = arith.cmpi eq, %arg1, %c0_i32 : i32
    %1 = arith.extui %0 : i1 to i32
    %c0_i32_0 = arith.constant 0 : i32
    %2 = arith.cmpi ne, %1, %c0_i32_0 : i32
    scf.if %2 {
      %c0_22 = arith.constant 0 : index
      %c0_23 = arith.constant 0 : index
      %c0_24 = arith.constant 0 : index
      %42 = vector.load %arg2[%c0_22, %c0_23, %c0_24] : memref<1x128x128xf32, #tpu.memory_space<vmem>>, vector<1x128x128xf32>
      %43 = vector.shape_cast %42 : vector<1x128x128xf32> to vector<128x128xf32>
      %44 = tpu.transpose %43, [1, 0] : vector<128x128xf32> -> vector<128x128xf32>
      %45 = arith.truncf %44 : vector<128x128xf32> to vector<128x128xbf16>
      %c0_25 = arith.constant 0 : index
      %c0_26 = arith.constant 0 : index
      %46 = vector.load %arg8[%c0_25, %c0_26] : memref<128x128xbf16, #tpu.memory_space<vmem>>, vector<128x128xbf16>
      tpu.vector_store %arg8[%c0_25, %c0_26], %45 {strides = array<i32>} : memref<128x128xbf16, #tpu.memory_space<vmem>>, vector<128x128xbf16>,
      %cst_27 = arith.constant 0.000000e+00 : f32
      %47 = vector.broadcast %cst_27 : f32 to vector<128x128xf32>
      %c0_28 = arith.constant 0 : index
      %c0_29 = arith.constant 0 : index
      %48 = vector.load %arg9[%c0_28, %c0_29] : memref<128x128xf32, #tpu.memory_space<vmem>>, vector<128x128xf32>
      tpu.vector_store %arg9[%c0_28, %c0_29], %47 {strides = array<i32>} : memref<128x128xf32, #tpu.memory_space<vmem>>, vector<128x128xf32>,
      %cst_30 = arith.constant 0.000000e+00 : f32
      %49 = vector.broadcast %cst_30 : f32 to vector<1x128xf32>
      %c0_31 = arith.constant 0 : index
      %c0_32 = arith.constant 0 : index
      %50 = vector.load %arg10[%c0_31, %c0_32] : memref<1x128xf32, #tpu.memory_space<vmem>>, vector<1x128xf32>
      tpu.vector_store %arg10[%c0_31, %c0_32], %49 {strides = array<i32>} : memref<1x128xf32, #tpu.memory_space<vmem>>, vector<1x128xf32>,
    } else {
    }
    %c128_i32 = arith.constant 128 : i32
    %3 = arith.muli %arg1, %c128_i32 : i32
    %4 = tpu.assume_multiple %3, 128 : i32
    %c0 = arith.constant 0 : index
    %5 = arith.index_cast %4 : i32 to index
    %c0_1 = arith.constant 0 : index
    %6 = vector.load %arg2[%c0, %5, %c0_1] : memref<1x128x128xf32, #tpu.memory_space<vmem>>, vector<1x128x128xf32>
    %7 = vector.shape_cast %6 : vector<1x128x128xf32> to vector<128x128xf32>
    %8 = arith.truncf %7 : vector<128x128xf32> to vector<128x128xbf16>
    %c0_2 = arith.constant 0 : index
    %c0_3 = arith.constant 0 : index
    %9 = vector.load %arg3[%c0_2, %c0_3] : memref<128x128xbf16, #tpu.memory_space<vmem>>, vector<128x128xbf16>
    %cst = arith.constant dense<0.000000e+00> : vector<128x128xf32>
    %10 = tpu.matmul %8, %9, %cst {dimension_numbers = #tpu.dot_dimension_numbers<[1], [0], [0], [1], [0, 0, 1, 1], [], []>} : vector<128x128xbf16>, vector<128x128xbf16>, vector<128x128xf32> -> vector<128x128xf32>
    %11 = arith.truncf %10 : vector<128x128xf32> to vector<128x128xbf16>
    %c0_4 = arith.constant 0 : index
    %c0_5 = arith.constant 0 : index
    %12 = vector.load %arg8[%c0_4, %c0_5] : memref<128x128xbf16, #tpu.memory_space<vmem>>, vector<128x128xbf16>
    %cst_6 = arith.constant dense<0.000000e+00> : vector<128x128xf32>
    %13 = tpu.matmul %11, %12, %cst_6 {dimension_numbers = #tpu.dot_dimension_numbers<[1], [0], [0], [1], [0, 0, 1, 1], [], []>} : vector<128x128xbf16>, vector<128x128xbf16>, vector<128x128xf32> -> vector<128x128xf32>
    %cst_7 = arith.constant dense<0xFF800000> : vector<128xf32>
    %14 = vector.multi_reduction <maximumf>, %13, %cst_7 [1] : vector<128x128xf32> to vector<128xf32>
    %15 = vector.shape_cast %14 : vector<128xf32> to vector<128x1xf32>
    %16 = vector.broadcast %15 : vector<128x1xf32> to vector<128x128xf32>
    %17 = arith.subf %13, %16 : vector<128x128xf32>
    %18 = arith.truncf %17 : vector<128x128xf32> to vector<128x128xbf16>
    %19 = math.exp %18 : vector<128x128xbf16>
    %20 = arith.extf %19 : vector<128x128xbf16> to vector<128x128xf32>
    %cst_8 = arith.constant dense<0.000000e+00> : vector<128xf32>
    %21 = vector.multi_reduction <add>, %20, %cst_8 [1] : vector<128x128xf32> to vector<128xf32>
    %22 = vector.shape_cast %21 : vector<128xf32> to vector<128x1xf32>
    %cst_9 = arith.constant 1.000000e+00 : f32
    %23 = vector.broadcast %cst_9 : f32 to vector<128x1xf32>
    %24 = arith.divf %23, %22 : vector<128x1xf32>
    %25 = tpu.transpose %24, [1, 0] : vector<128x1xf32> -> vector<1x128xf32>
    %c0_10 = arith.constant 0 : index
    %c0_11 = arith.constant 0 : index
    %26 = vector.load %arg10[%c0_10, %c0_11] : memref<1x128xf32, #tpu.memory_space<vmem>>, vector<1x128xf32>
    %27 = arith.truncf %25 : vector<1x128xf32> to vector<1x128xbf16>
    %cst_12 = arith.constant dense<0.000000e+00> : vector<1x128xf32>
    %28 = tpu.matmul %27, %19, %cst_12 {dimension_numbers = #tpu.dot_dimension_numbers<[1], [0], [0], [1], [0, 0, 1, 1], [], []>} : vector<1x128xbf16>, vector<128x128xbf16>, vector<1x128xf32> -> vector<1x128xf32>
    %29 = arith.addf %26, %28 : vector<1x128xf32>
    %c0_13 = arith.constant 0 : index
    %c0_14 = arith.constant 0 : index
    %30 = vector.load %arg10[%c0_13, %c0_14] : memref<1x128xf32, #tpu.memory_space<vmem>>, vector<1x128xf32>
    tpu.vector_store %arg10[%c0_13, %c0_14], %29 {strides = array<i32>} : memref<1x128xf32, #tpu.memory_space<vmem>>, vector<1x128xf32>,
    %31 = vector.broadcast %24 : vector<128x1xf32> to vector<128x128xf32>
    %32 = arith.mulf %7, %31 : vector<128x128xf32>
    %33 = tpu.transpose %32, [1, 0] : vector<128x128xf32> -> vector<128x128xf32>
    %34 = arith.truncf %33 : vector<128x128xf32> to vector<128x128xbf16>
    %c0_15 = arith.constant 0 : index
    %c0_16 = arith.constant 0 : index
    %35 = vector.load %arg9[%c0_15, %c0_16] : memref<128x128xf32, #tpu.memory_space<vmem>>, vector<128x128xf32>
    %cst_17 = arith.constant dense<0.000000e+00> : vector<128x128xf32>
    %36 = tpu.matmul %34, %19, %cst_17 {dimension_numbers = #tpu.dot_dimension_numbers<[1], [0], [0], [1], [0, 0, 1, 1], [], []>} : vector<128x128xbf16>, vector<128x128xbf16>, vector<128x128xf32> -> vector<128x128xf32>
    %37 = arith.addf %35, %36 : vector<128x128xf32>
    %c0_18 = arith.constant 0 : index
    %c0_19 = arith.constant 0 : index
    %38 = vector.load %arg9[%c0_18, %c0_19] : memref<128x128xf32, #tpu.memory_space<vmem>>, vector<128x128xf32>
    tpu.vector_store %arg9[%c0_18, %c0_19], %37 {strides = array<i32>} : memref<128x128xf32, #tpu.memory_space<vmem>>, vector<128x128xf32>,
    %c0_i32_20 = arith.constant 0 : i32
    %39 = arith.cmpi eq, %arg1, %c0_i32_20 : i32
    %40 = arith.extui %39 : i1 to i32
    %c0_i32_21 = arith.constant 0 : i32
    %41 = arith.cmpi ne, %40, %c0_i32_21 : i32
    scf.if %41 {
      %c0_22 = arith.constant 0 : index
      %c0_23 = arith.constant 0 : index
      %42 = vector.load %arg10[%c0_22, %c0_23] : memref<1x128xf32, #tpu.memory_space<vmem>>, vector<1x128xf32>
      %cst_24 = arith.constant 9.99999997E-7 : f32
      %43 = vector.broadcast %cst_24 : f32 to vector<1x128xf32>
      %44 = arith.addf %43, %42 : vector<1x128xf32>
      %cst_25 = arith.constant 1.000000e+00 : f32
      %45 = vector.broadcast %cst_25 : f32 to vector<1x128xf32>
      %46 = arith.divf %45, %44 : vector<1x128xf32>
      %c0_26 = arith.constant 0 : index
      %c0_27 = arith.constant 0 : index
      %47 = vector.load %arg9[%c0_26, %c0_27] : memref<128x128xf32, #tpu.memory_space<vmem>>, vector<128x128xf32>
      %48 = vector.broadcast %46 : vector<1x128xf32> to vector<128x128xf32>
      %49 = arith.mulf %47, %48 : vector<128x128xf32>
      %c0_28 = arith.constant 0 : index
      %c0_29 = arith.constant 0 : index
      %c0_30 = arith.constant 0 : index
      %50 = vector.load %arg2[%c0_28, %c0_29, %c0_30] : memref<1x128x128xf32, #tpu.memory_space<vmem>>, vector<1x128x128xf32>
      %51 = vector.shape_cast %50 : vector<1x128x128xf32> to vector<128x128xf32>
      %52 = tpu.transpose %51, [1, 0] : vector<128x128xf32> -> vector<128x128xf32>
      %53 = arith.subf %52, %49 : vector<128x128xf32>
      %c0_31 = arith.constant 0 : index
      %c0_32 = arith.constant 0 : index
      %54 = vector.load %arg4[%c0_31, %c0_32] : memref<128x128xbf16, #tpu.memory_space<vmem>>, vector<128x128xbf16>
      %55 = arith.truncf %53 : vector<128x128xf32> to vector<128x128xbf16>
      %cst_33 = arith.constant dense<0.000000e+00> : vector<128x128xf32>
      %56 = tpu.matmul %54, %55, %cst_33 {dimension_numbers = #tpu.dot_dimension_numbers<[1], [0], [0], [1], [0, 0, 1, 1], [], []>} : vector<128x128xbf16>, vector<128x128xbf16>, vector<128x128xf32> -> vector<128x128xf32>
      %57 = tpu.transpose %56, [1, 0] : vector<128x128xf32> -> vector<128x128xf32>
      %cst_34 = arith.constant dense<0.000000e+00> : vector<128xf32>
      %58 = vector.multi_reduction <add>, %57, %cst_34 [0] : vector<128x128xf32> to vector<128xf32>
      %59 = vector.shape_cast %58 : vector<128xf32> to vector<1x128xf32>
      %cst_35 = arith.constant 7.812500e-03 : f32
      %60 = vector.broadcast %cst_35 : f32 to vector<1x128xf32>
      %61 = arith.mulf %59, %60 : vector<1x128xf32>
      %62 = vector.broadcast %61 : vector<1x128xf32> to vector<128x128xf32>
      %63 = arith.subf %57, %62 : vector<128x128xf32>
      %c0_36 = arith.constant 0 : index
      %c0_37 = arith.constant 0 : index
      %c0_38 = arith.constant 0 : index
      %64 = vector.load %arg6[%c0_36, %c0_37, %c0_38] : memref<1x1x128xf32, #tpu.memory_space<vmem>>, vector<1x1x128xf32>
      %65 = vector.shape_cast %64 : vector<1x1x128xf32> to vector<1x128xf32>
      %66 = vector.shape_cast %59 : vector<1x128xf32> to vector<1x1x128xf32>
      tpu.vector_store %arg6[%c0_36, %c0_37, %c0_38], %66 {strides = array<i32>} : memref<1x1x128xf32, #tpu.memory_space<vmem>>, vector<1x1x128xf32>,
      %67 = arith.mulf %63, %63 : vector<128x128xf32>
      %cst_39 = arith.constant dense<0.000000e+00> : vector<128xf32>
      %68 = vector.multi_reduction <add>, %67, %cst_39 [0] : vector<128x128xf32> to vector<128xf32>
      %69 = vector.shape_cast %68 : vector<128xf32> to vector<1x128xf32>
      %c0_40 = arith.constant 0 : index
      %c0_41 = arith.constant 0 : index
      %c0_42 = arith.constant 0 : index
      %70 = vector.load %arg7[%c0_40, %c0_41, %c0_42] : memref<1x1x128xf32, #tpu.memory_space<vmem>>, vector<1x1x128xf32>
      %71 = vector.shape_cast %70 : vector<1x1x128xf32> to vector<1x128xf32>
      %72 = vector.shape_cast %69 : vector<1x128xf32> to vector<1x1x128xf32>
      tpu.vector_store %arg7[%c0_40, %c0_41, %c0_42], %72 {strides = array<i32>} : memref<1x1x128xf32, #tpu.memory_space<vmem>>, vector<1x1x128xf32>,
      %73 = arith.truncf %57 : vector<128x128xf32> to vector<128x128xbf16>
      %c0_43 = arith.constant 0 : index
      %c0_44 = arith.constant 0 : index
      %c0_45 = arith.constant 0 : index
      %74 = vector.load %arg5[%c0_43, %c0_44, %c0_45] : memref<1x128x128xbf16, #tpu.memory_space<vmem>>, vector<1x128x128xbf16>
      %75 = vector.shape_cast %74 : vector<1x128x128xbf16> to vector<128x128xbf16>
      %76 = vector.shape_cast %73 : vector<128x128xbf16> to vector<1x128x128xbf16>
      tpu.vector_store %arg5[%c0_43, %c0_44, %c0_45], %76 {strides = array<i32>} : memref<1x128x128xbf16, #tpu.memory_space<vmem>>, vector<1x128x128xbf16>,
    } else {
    }
    return
  }
  func.func @transform_0(%arg0: i32, %arg1: i32) -> (i32, i32, i32) {
    %c0_i32 = arith.constant 0 : i32
    %c0_i32_0 = arith.constant 0 : i32
    %c0_i32_1 = arith.constant 0 : i32
    return %arg0, %c0_i32, %c0_i32_0 : i32, i32, i32
  }
  func.func @transform_1(%arg0: i32, %arg1: i32) -> (i32, i32) {
    %c0_i32 = arith.constant 0 : i32
    %c0_i32_0 = arith.constant 0 : i32
    %c0_i32_1 = arith.constant 0 : i32
    return %c0_i32, %c0_i32_0 : i32, i32
  }
  func.func @transform_2(%arg0: i32, %arg1: i32) -> (i32, i32) {
    %c0_i32 = arith.constant 0 : i32
    %c0_i32_0 = arith.constant 0 : i32
    %c0_i32_1 = arith.constant 0 : i32
    return %c0_i32, %c0_i32_0 : i32, i32
  }
  func.func @transform_3(%arg0: i32, %arg1: i32) -> (i32, i32, i32) {
    %c0_i32 = arith.constant 0 : i32
    %c0_i32_0 = arith.constant 0 : i32
    %c0_i32_1 = arith.constant 0 : i32
    return %arg0, %c0_i32, %c0_i32_0 : i32, i32, i32
  }
  func.func @transform_4(%arg0: i32, %arg1: i32) -> (i32, i32, i32) {
    %c0_i32 = arith.constant 0 : i32
    %c0_i32_0 = arith.constant 0 : i32
    %c0_i32_1 = arith.constant 0 : i32
    return %arg0, %c0_i32, %c0_i32_0 : i32, i32, i32
  }
  func.func @transform_5(%arg0: i32, %arg1: i32) -> (i32, i32, i32) {
    %c0_i32 = arith.constant 0 : i32
    %c0_i32_0 = arith.constant 0 : i32
    %c0_i32_1 = arith.constant 0 : i32
    return %arg0, %c0_i32, %c0_i32_0 : i32, i32, i32
  }
}

module attributes {stable_mosaic.version = 11 : i64} {
  func.func @bn_apply_kernel(%arg0: i32, %arg1: memref<256x128xf32, #tpu.memory_space<vmem>>, %arg2: memref<256x128xbf16, #tpu.memory_space<vmem>>, %arg3: memref<1x128xf32, #tpu.memory_space<vmem>>, %arg4: memref<1x128xf32, #tpu.memory_space<vmem>>, %arg5: memref<256x128xf32, #tpu.memory_space<vmem>>) attributes {dimension_semantics = [#tpu.dimension_semantics<parallel>], iteration_bounds = array<i64: 1>, scalar_prefetch = 0 : i64, scratch_operands = 0 : i64, tpu.core_type = #tpu.core_type<tc>, window_params = [{transform_indices = @transform_0, window_bounds = array<i64: 256, 128>}, {transform_indices = @transform_1, window_bounds = array<i64: 256, 128>}, {pipeline_mode = #tpu.pipeline_mode<synchronous>, transform_indices = @transform_2, window_bounds = array<i64: 1, 128>}, {pipeline_mode = #tpu.pipeline_mode<synchronous>, transform_indices = @transform_3, window_bounds = array<i64: 1, 128>}, {transform_indices = @transform_4, window_bounds = array<i64: 256, 128>}]} {
    %c0 = arith.constant 0 : index
    %c0_0 = arith.constant 0 : index
    %0 = vector.load %arg2[%c0, %c0_0] : memref<256x128xbf16, #tpu.memory_space<vmem>>, vector<256x128xbf16>
    %1 = arith.extf %0 : vector<256x128xbf16> to vector<256x128xf32>
    %c0_1 = arith.constant 0 : index
    %c0_2 = arith.constant 0 : index
    %2 = vector.load %arg3[%c0_1, %c0_2] : memref<1x128xf32, #tpu.memory_space<vmem>>, vector<1x128xf32>
    %3 = vector.broadcast %2 : vector<1x128xf32> to vector<256x128xf32>
    %4 = arith.mulf %1, %3 : vector<256x128xf32>
    %c0_3 = arith.constant 0 : index
    %c0_4 = arith.constant 0 : index
    %5 = vector.load %arg4[%c0_3, %c0_4] : memref<1x128xf32, #tpu.memory_space<vmem>>, vector<1x128xf32>
    %6 = vector.broadcast %5 : vector<1x128xf32> to vector<256x128xf32>
    %7 = arith.addf %4, %6 : vector<256x128xf32>
    %c0_5 = arith.constant 0 : index
    %c0_6 = arith.constant 0 : index
    %8 = vector.load %arg1[%c0_5, %c0_6] : memref<256x128xf32, #tpu.memory_space<vmem>>, vector<256x128xf32>
    %cst = arith.constant 0.000000e+00 : f32
    %9 = vector.broadcast %cst : f32 to vector<256x128xf32>
    %10 = arith.maximumf %7, %9 : vector<256x128xf32>
    %11 = arith.addf %8, %10 : vector<256x128xf32>
    %c0_7 = arith.constant 0 : index
    %c0_8 = arith.constant 0 : index
    %12 = vector.load %arg5[%c0_7, %c0_8] : memref<256x128xf32, #tpu.memory_space<vmem>>, vector<256x128xf32>
    tpu.vector_store %arg5[%c0_7, %c0_8], %11 {strides = array<i32>} : memref<256x128xf32, #tpu.memory_space<vmem>>, vector<256x128xf32>,
    return
  }
  func.func @transform_0(%arg0: i32) -> (i32, i32) {
    %c0_i32 = arith.constant 0 : i32
    %c0_i32_0 = arith.constant 0 : i32
    return %arg0, %c0_i32 : i32, i32
  }
  func.func @transform_1(%arg0: i32) -> (i32, i32) {
    %c0_i32 = arith.constant 0 : i32
    %c0_i32_0 = arith.constant 0 : i32
    return %arg0, %c0_i32 : i32, i32
  }
  func.func @transform_2(%arg0: i32) -> (i32, i32) {
    %c0_i32 = arith.constant 0 : i32
    %c0_i32_0 = arith.constant 0 : i32
    %c0_i32_1 = arith.constant 0 : i32
    return %c0_i32, %c0_i32_0 : i32, i32
  }
  func.func @transform_3(%arg0: i32) -> (i32, i32) {
    %c0_i32 = arith.constant 0 : i32
    %c0_i32_0 = arith.constant 0 : i32
    %c0_i32_1 = arith.constant 0 : i32
    return %c0_i32, %c0_i32_0 : i32, i32
  }
  func.func @transform_4(%arg0: i32) -> (i32, i32) {
    %c0_i32 = arith.constant 0 : i32
    %c0_i32_0 = arith.constant 0 : i32
    return %arg0, %c0_i32 : i32, i32
  }
}

</mosaic_0001>

<bundles_post_ra>
// kernel: sa_layer_single_head.3
= control target key start
LH: loop header
LB: loop body
LE: loop exit
PB: predicated region body
PF: predicated region fallthrough
CT: control target
= control target key end

     0   :  { %s670_s0 = inlined_call_operand.vmem [shape: f32[256,128], index: 0, kind: input, shape index: {}]   ;;  %s671_s1 = inlined_call_operand.vmem [shape: bf16[256,128], index: 1, kind: input, shape index: {}]   ;;  %s672_s2 = inlined_call_operand.vmem [shape: f32[1,128], index: 2, kind: input, shape index: {}]   ;;  %s673_s3 = inlined_call_operand.vmem [shape: f32[1,128], index: 3, kind: input, shape index: {}]   ;;  %s674_s4 = inlined_call_operand.hbm [shape: f32[256,128], index: 4, kind: output, shape index: {}]  }
   0x1   :  { %v307_v0 = vld [vmem:[%s671_s1] sm:$0xff]   ;;  %v370_v4 = vld [vmem:[%s671_s1 + $0x8] sm:$0xff]   ;;  %v371_v8 = vld [vmem:[%s671_s1 + $0x10] sm:$0xff]  }
   0x2   :  { %v446_v1 = vld [vmem:[%s672_s2] ss:$0 sm:$0xff]  ;;  %v308_v2 = vunpack.c.l.bf16 %v307_v0  ;;  %v309_v3 = vunpack.c.h.bf16 %v307_v0  ;;  %v312_v6 = vunpack.c.l.bf16 %v370_v4  ;;  %v313_v7 = vunpack.c.h.bf16 %v370_v4  ;;  %v372_v13 = vld [vmem:[%s671_s1 + $0x18] sm:$0xff]   ;;  %v161_v23 = vld [vmem:[%s670_s0 + $0x8] sm:$0xff] }
   0x3   :  { %v454_v5 = vld [vmem:[%s673_s3] ss:$0 sm:$0xff]  ;;  %v316_v11 = vunpack.c.l.bf16 %v371_v8  ;;  %v317_v12 = vunpack.c.h.bf16 %v371_v8  ;;  %v320_v16 = vunpack.c.l.bf16 %v372_v13  ;;  %v321_v17 = vunpack.c.h.bf16 %v372_v13  ;;  %v162_v30 = vld [vmem:[%s670_s0 + $0x10] sm:$0xff]  ;;  %v163_v31 = vld [vmem:[%s670_s0 + $0x18] sm:$0xff] }
   0x4   :  { %v89_v9 = vmul.f32 %v308_v2, %v446_v1  ;;  %v90_v10 = vmul.f32 %v309_v3, %v446_v1  ;;  %v91_v14 = vmul.f32 %v312_v6, %v446_v1  ;;  %v92_v15 = vmul.f32 %v313_v7, %v446_v1  ;;  %v160_v22 = vld [vmem:[%s670_s0] sm:$0xff]  ;;  %v165_v37 = vld [vmem:[%s670_s0 + $0x28] sm:$0xff]  ;;  %v166_v45 = vld [vmem:[%s670_s0 + $0x30] sm:$0xff] }
   0x5   :  { %v93_v20 = vmul.f32 %v316_v11, %v446_v1  ;;  %v94_v21 = vmul.f32 %v317_v12, %v446_v1  ;;  %v95_v26 = vmul.f32 %v320_v16, %v446_v1  ;;  %v96_v27 = vmul.f32 %v321_v17, %v446_v1  ;;  %v164_v36 = vld [vmem:[%s670_s0 + $0x20] sm:$0xff]  ;;  %v167_v46 = vld [vmem:[%s670_s0 + $0x38] sm:$0xff]  ;;  %v374_v47 = vld [vmem:[%s671_s1 + $0x28] sm:$0xff]  }
   0x6   :  { %v128_v18 = vadd.f32 %v454_v5, %v89_v9  ;;  %v129_v19 = vadd.f32 %v454_v5, %v90_v10  ;;  %v130_v24 = vadd.f32 %v454_v5, %v91_v14  ;;  %v131_v25 = vadd.f32 %v454_v5, %v92_v15  ;;  %v373_v40 = vld [vmem:[%s671_s1 + $0x20] sm:$0xff]   ;;  %v375_v52 = vld [vmem:[%s671_s1 + $0x30] sm:$0xff]   ;;  %v376_v57 = vld [vmem:[%s671_s1 + $0x38] sm:$0xff]  }
   0x7   :  { %v132_v32 = vadd.f32 %v454_v5, %v93_v20  ;;  %v133_v33 = vadd.f32 %v454_v5, %v94_v21  ;;  %v134_v38 = vadd.f32 %v454_v5, %v95_v26  ;;  %v135_v39 = vadd.f32 %v454_v5, %v96_v27  ;;  %v168_v12 = vld [vmem:[%s670_s0 + $0x40] sm:$0xff]  ;;  %v169_v13 = vld [vmem:[%s670_s0 + $0x48] sm:$0xff] }
   0x8   :  { %v192_v28 = vmax.f32 %v128_v18, 0.0  ;;  %v193_v29 = vmax.f32 %v129_v19, 0.0  ;;  %v194_v34 = vmax.f32 %v130_v24, 0.0  ;;  %v195_v35 = vmax.f32 %v131_v25, 0.0 }
   0x9   :  { %v196_v43 = vmax.f32 %v132_v32, 0.0  ;;  %v197_v44 = vmax.f32 %v133_v33, 0.0  ;;  %v198_v50 = vmax.f32 %v134_v38, 0.0  ;;  %v199_v51 = vmax.f32 %v135_v39, 0.0 }
   0xa   :  { %v224_v41 = vadd.f32 %v192_v28, %v160_v22  ;;  %v225_v42 = vadd.f32 %v193_v29, %v161_v23  ;;  %v226_v48 = vadd.f32 %v194_v34, %v162_v30  ;;  %v227_v49 = vadd.f32 %v195_v35, %v163_v31 }
   0xb   :  { %v228_v53 = vadd.f32 %v196_v43, %v164_v36  ;;  %v229_v54 = vadd.f32 %v197_v44, %v165_v37  ;;  %v324_v55 = vunpack.c.l.bf16 %v373_v40  ;;  %v325_v56 = vunpack.c.h.bf16 %v373_v40 }
   0xc   :  { %256 = vst [vmem:[#allocation2] sm:$0xff] %v224_v41  ;;  %257 = vst [vmem:[#allocation2 + $0x8] sm:$0xff] %v225_v42  ;;  %v230_v58 = vadd.f32 %v198_v50, %v166_v45  ;;  %v231_v59 = vadd.f32 %v199_v51, %v167_v46  ;;  %v328_v60 = vunpack.c.l.bf16 %v374_v47  ;;  %v329_v61 = vunpack.c.h.bf16 %v374_v47 }
   0xd   :  { %258 = vst [vmem:[#allocation2 + $0x10] sm:$0xff] %v226_v48  ;;  %259 = vst [vmem:[#allocation2 + $0x18] sm:$0xff] %v227_v49  ;;  %v97_v62 = vmul.f32 %v324_v55, %v446_v1  ;;  %v98_v63 = vmul.f32 %v325_v56, %v446_v1  ;;  %v332_v0 = vunpack.c.l.bf16 %v375_v52  ;;  %v333_v2 = vunpack.c.h.bf16 %v375_v52 }
   0xe   :  { %260 = vst [vmem:[#allocation2 + $0x20] sm:$0xff] %v228_v53  ;;  %261 = vst [vmem:[#allocation2 + $0x28] sm:$0xff] %v229_v54  ;;  %v99_v3 = vmul.f32 %v328_v60, %v446_v1  ;;  %v100_v4 = vmul.f32 %v329_v61, %v446_v1  ;;  %v336_v6 = vunpack.c.l.bf16 %v376_v57  ;;  %v337_v7 = vunpack.c.h.bf16 %v376_v57 }
   0xf   :  { %262 = vst [vmem:[#allocation2 + $0x30] sm:$0xff] %v230_v58  ;;  %263 = vst [vmem:[#allocation2 + $0x38] sm:$0xff] %v231_v59  ;;  %v136_v8 = vadd.f32 %v454_v5, %v97_v62  ;;  %v137_v9 = vadd.f32 %v454_v5, %v98_v63  ;;  %v101_v10 = vmul.f32 %v332_v0, %v446_v1 }
  0x10   :  { %v102_v11 = vmul.f32 %v333_v2, %v446_v1  ;;  %v138_v14 = vadd.f32 %v454_v5, %v99_v3  ;;  %v139_v15 = vadd.f32 %v454_v5, %v100_v4  ;;  %v103_v16 = vmul.f32 %v336_v6, %v446_v1 }
  0x11   :  { %v104_v17 = vmul.f32 %v337_v7, %v446_v1 }
  0x12   :  { %9 = vsyncpa [#allocation3], 0  ;;  %v200_v18 = vmax.f32 %v136_v8, 0.0  ;;  %v201_v19 = vmax.f32 %v137_v9, 0.0  ;;  %v170_v20 = vld [vmem:[%s670_s0 + $0x50] sm:$0xff]  ;;  %v171_v21 = vld [vmem:[%s670_s0 + $0x58] sm:$0xff]  ;;  %v140_v22 = vadd.f32 %v454_v5, %v101_v10  ;;  %v141_v23 = vadd.f32 %v454_v5, %v102_v11 }
  0x13   :  { %v202_v24 = vmax.f32 %v138_v14, 0.0  ;;  %v203_v25 = vmax.f32 %v139_v15, 0.0  ;;  %v172_v26 = vld [vmem:[%s670_s0 + $0x60] sm:$0xff]  ;;  %v173_v27 = vld [vmem:[%s670_s0 + $0x68] sm:$0xff]  ;;  %v142_v28 = vadd.f32 %v454_v5, %v103_v16  ;;  %v143_v29 = vadd.f32 %v454_v5, %v104_v17  ;;  %v174_v35 = vld [vmem:[%s670_s0 + $0x70] sm:$0xff]  ;;  %s412_s28 = smov [#allocation2]  }
  0x14   :  { %v377_v30 = vld [vmem:[%s671_s1 + $0x40] sm:$0xff]   ;;  %v232_v31 = vadd.f32 %v200_v18, %v168_v12  ;;  %v233_v32 = vadd.f32 %v201_v19, %v169_v13  ;;  %v204_v33 = vmax.f32 %v140_v22, 0.0  ;;  %v205_v34 = vmax.f32 %v141_v23, 0.0  ;;  %v175_v36 = vld [vmem:[%s670_s0 + $0x78] sm:$0xff]  ;;  %v378_v37 = vld [vmem:[%s671_s1 + $0x48] sm:$0xff]   ;;  %s293_s29 = sshll.u32 %s412_s28, 4  ;;  %s294_s29 = int_to_ptr.vmem [resolvable:$true] %s293_s29 }
  0x15   :  { %v234_v38 = vadd.f32 %v202_v24, %v170_v20  ;;  %v235_v39 = vadd.f32 %v203_v25, %v171_v21  ;;  %v206_v40 = vmax.f32 %v142_v28, 0.0  ;;  %v207_v41 = vmax.f32 %v143_v29, 0.0  ;;  %v379_v42 = vld [vmem:[%s671_s1 + $0x50] sm:$0xff]   ;;  %v380_v47 = vld [vmem:[%s671_s1 + $0x58] sm:$0xff]   ;;  %v176_v0 = vld [vmem:[%s670_s0 + $0x80] sm:$0xff]  ;;  %p393_p1 = scmp.lt.s32.totalorder %s294_s29, %s294_s29 }
  0x16   :  { %264 = vst [vmem:[#allocation2 + $0x40] sm:$0xff] %v232_v31  ;;  %265 = vst [vmem:[#allocation2 + $0x48] sm:$0xff] %v233_v32  ;;  %v236_v43 = vadd.f32 %v204_v33, %v172_v26  ;;  %v237_v44 = vadd.f32 %v205_v34, %v173_v27  ;;  %v340_v45 = vunpack.c.l.bf16 %v377_v30  ;;  %v341_v46 = vunpack.c.h.bf16 %v377_v30  ;;  %v177_v2 = vld [vmem:[%s670_s0 + $0x88] sm:$0xff]  ;;  %v178_v10 = vld [vmem:[%s670_s0 + $0x90] sm:$0xff] }
  0x17   :  { %266 = vst [vmem:[#allocation2 + $0x50] sm:$0xff] %v234_v38  ;;  %267 = vst [vmem:[#allocation2 + $0x58] sm:$0xff] %v235_v39  ;;  %v238_v48 = vadd.f32 %v206_v40, %v174_v35  ;;  %v239_v49 = vadd.f32 %v207_v41, %v175_v36  ;;  %v344_v50 = vunpack.c.l.bf16 %v378_v37  ;;  %v345_v51 = vunpack.c.h.bf16 %v378_v37  ;;  %v179_v11 = vld [vmem:[%s670_s0 + $0x98] sm:$0xff]  ;;  %v180_v16 = vld [vmem:[%s670_s0 + $0xa0] sm:$0xff] }
  0x18   :  { %268 = vst [vmem:[#allocation2 + $0x60] sm:$0xff] %v236_v43  ;;  %269 = vst [vmem:[#allocation2 + $0x68] sm:$0xff] %v237_v44  ;;  %v105_v52 = vmul.f32 %v340_v45, %v446_v1  ;;  %v106_v53 = vmul.f32 %v341_v46, %v446_v1  ;;  %v348_v54 = vunpack.c.l.bf16 %v379_v42  ;;  %v349_v55 = vunpack.c.h.bf16 %v379_v42  ;;  %v181_v17 = vld [vmem:[%s670_s0 + $0xa8] sm:$0xff]  ;;  %v381_v20 = vld [vmem:[%s671_s1 + $0x60] sm:$0xff]  }
  0x19   :  { %270 = vst [vmem:[#allocation2 + $0x70] sm:$0xff] %v238_v48  ;;  %271 = vst [vmem:[#allocation2 + $0x78] sm:$0xff] %v239_v49  ;;  %v107_v56 = vmul.f32 %v344_v50, %v446_v1  ;;  %v108_v57 = vmul.f32 %v345_v51, %v446_v1  ;;  %v352_v58 = vunpack.c.l.bf16 %v380_v47  ;;  %v353_v59 = vunpack.c.h.bf16 %v380_v47  ;;  %v182_v25 = vld [vmem:[%s670_s0 + $0xb0] sm:$0xff]  ;;  %v183_v26 = vld [vmem:[%s670_s0 + $0xb8] sm:$0xff] }
  0x1a   :  { %v144_v60 = vadd.f32 %v454_v5, %v105_v52  ;;  %v145_v61 = vadd.f32 %v454_v5, %v106_v53  ;;  %v109_v62 = vmul.f32 %v348_v54, %v446_v1  ;;  %v110_v63 = vmul.f32 %v349_v55, %v446_v1  ;;  %v382_v27 = vld [vmem:[%s671_s1 + $0x68] sm:$0xff]   ;;  %v383_v32 = vld [vmem:[%s671_s1 + $0x70] sm:$0xff]   ;;  %v384_v37 = vld [vmem:[%s671_s1 + $0x78] sm:$0xff]  }
  0x1b   :  { %v146_v3 = vadd.f32 %v454_v5, %v107_v56  ;;  %v147_v4 = vadd.f32 %v454_v5, %v108_v57  ;;  %v111_v6 = vmul.f32 %v352_v58, %v446_v1  ;;  %v112_v7 = vmul.f32 %v353_v59, %v446_v1  ;;  %v184_v54 = vld [vmem:[%s670_s0 + $0xc0] sm:$0xff]  ;;  %v185_v55 = vld [vmem:[%s670_s0 + $0xc8] sm:$0xff] }
  0x1c   :  { %v208_v8 = vmax.f32 %v144_v60, 0.0  ;;  %v209_v9 = vmax.f32 %v145_v61, 0.0  ;;  %v148_v12 = vadd.f32 %v454_v5, %v109_v62  ;;  %v149_v13 = vadd.f32 %v454_v5, %v110_v63  ;;  %v186_v62 = vld [vmem:[%s670_s0 + $0xd0] sm:$0xff]  ;;  %v187_v63 = vld [vmem:[%s670_s0 + $0xd8] sm:$0xff] }
  0x1d   :  { %v210_v14 = vmax.f32 %v146_v3, 0.0  ;;  %v211_v15 = vmax.f32 %v147_v4, 0.0  ;;  %v150_v18 = vadd.f32 %v454_v5, %v111_v6  ;;  %v151_v19 = vadd.f32 %v454_v5, %v112_v7  ;;  %v189_v6 = vld [vmem:[%s670_s0 + $0xe8] sm:$0xff] }
  0x1e   :  { %v240_v21 = vadd.f32 %v208_v8, %v176_v0  ;;  %v241_v22 = vadd.f32 %v209_v9, %v177_v2  ;;  %v212_v23 = vmax.f32 %v148_v12, 0.0  ;;  %v213_v24 = vmax.f32 %v149_v13, 0.0  ;;  %v190_v13 = vld [vmem:[%s670_s0 + $0xf0] sm:$0xff] }
  0x1f   :  { %v242_v28 = vadd.f32 %v210_v14, %v178_v10  ;;  %v243_v29 = vadd.f32 %v211_v15, %v179_v11  ;;  %v214_v30 = vmax.f32 %v150_v18, 0.0  ;;  %v215_v31 = vmax.f32 %v151_v19, 0.0  ;;  %v191_v14 = vld [vmem:[%s670_s0 + $0xf8] sm:$0xff] }
  0x20   :  { %272 = vst [vmem:[#allocation2 + $0x80] sm:$0xff] %v240_v21  ;;  %273 = vst [vmem:[#allocation2 + $0x88] sm:$0xff] %v241_v22  ;;  %v244_v33 = vadd.f32 %v212_v23, %v180_v16  ;;  %v245_v34 = vadd.f32 %v213_v24, %v181_v17  ;;  %v356_v35 = vunpack.c.l.bf16 %v381_v20  ;;  %v357_v36 = vunpack.c.h.bf16 %v381_v20 }
  0x21   :  { %274 = vst [vmem:[#allocation2 + $0x90] sm:$0xff] %v242_v28  ;;  %275 = vst [vmem:[#allocation2 + $0x98] sm:$0xff] %v243_v29  ;;  %v246_v38 = vadd.f32 %v214_v30, %v182_v25  ;;  %v247_v39 = vadd.f32 %v215_v31, %v183_v26  ;;  %v360_v40 = vunpack.c.l.bf16 %v382_v27  ;;  %v361_v41 = vunpack.c.h.bf16 %v382_v27 }
  0x22   :  { %276 = vst [vmem:[#allocation2 + $0xa0] sm:$0xff] %v244_v33  ;;  %277 = vst [vmem:[#allocation2 + $0xa8] sm:$0xff] %v245_v34  ;;  %v113_v42 = vmul.f32 %v356_v35, %v446_v1  ;;  %v114_v43 = vmul.f32 %v357_v36, %v446_v1  ;;  %v364_v44 = vunpack.c.l.bf16 %v383_v32  ;;  %v365_v45 = vunpack.c.h.bf16 %v383_v32 }
  0x23   :  { %278 = vst [vmem:[#allocation2 + $0xb0] sm:$0xff] %v246_v38  ;;  %279 = vst [vmem:[#allocation2 + $0xb8] sm:$0xff] %v247_v39  ;;  %v115_v46 = vmul.f32 %v360_v40, %v446_v1  ;;  %v116_v47 = vmul.f32 %v361_v41, %v446_v1  ;;  %v368_v48 = vunpack.c.l.bf16 %v384_v37  ;;  %v369_v49 = vunpack.c.h.bf16 %v384_v37 }
  0x24   :  { %v152_v50 = vadd.f32 %v454_v5, %v113_v42  ;;  %v153_v51 = vadd.f32 %v454_v5, %v114_v43  ;;  %v117_v52 = vmul.f32 %v364_v44, %v446_v1  ;;  %v118_v53 = vmul.f32 %v365_v45, %v446_v1 }
  0x25   :  { %v154_v56 = vadd.f32 %v454_v5, %v115_v46  ;;  %v155_v57 = vadd.f32 %v454_v5, %v116_v47  ;;  %v119_v58 = vmul.f32 %v368_v48, %v446_v1  ;;  %v120_v59 = vmul.f32 %v369_v49, %v446_v1  ;;  %v188_v1 = vld [vmem:[%s670_s0 + $0xe0] sm:$0xff]  ;;  %s388_s0 = scalar_lea.vmem %s294_s29, 4096 }
  0x26   :  { %v216_v60 = vmax.f32 %v152_v50, 0.0  ;;  %v217_v61 = vmax.f32 %v153_v51, 0.0  ;;  %v156_v0 = vadd.f32 %v454_v5, %v117_v52  ;;  %v157_v2 = vadd.f32 %v454_v5, %v118_v53  ;;  %p389_p0 = scmp.ne.s32.totalorder %s294_s29, %s388_s0  ;;  %p394_p2 = scmp.lt.s32.totalorder %s388_s0, %s388_s0 }
  0x27   :  { %v218_v3 = vmax.f32 %v154_v56, 0.0  ;;  %v219_v4 = vmax.f32 %v155_v57, 0.0  ;;  %v158_v7 = vadd.f32 %v454_v5, %v119_v58  ;;  %v159_v8 = vadd.f32 %v454_v5, %v120_v59 }
  0x28   :  { %v248_v9 = vadd.f32 %v216_v60, %v184_v54  ;;  %v249_v10 = vadd.f32 %v217_v61, %v185_v55  ;;  %v220_v11 = vmax.f32 %v156_v0, 0.0  ;;  %v221_v12 = vmax.f32 %v157_v2, 0.0  ;;  %p395_p3 = por %p394_p2, %p393_p1 }
  0x29   :  { %v250_v15 = vadd.f32 %v218_v3, %v186_v62  ;;  %v251_v16 = vadd.f32 %v219_v4, %v187_v63  ;;  %v222_v17 = vmax.f32 %v158_v7, 0.0  ;;  %v223_v18 = vmax.f32 %v159_v8, 0.0 }
  0x2a   :  { %280 = vst [vmem:[#allocation2 + $0xc0] sm:$0xff] %v248_v9  ;;  %281 = vst [vmem:[#allocation2 + $0xc8] sm:$0xff] %v249_v10  ;;  %v252_v5 = vadd.f32 %v220_v11, %v188_v1  ;;  %v253_v19 = vadd.f32 %v221_v12, %v189_v6  ;;  %p396_p4 = pnand %p395_p3, %p389_p0 }
  0x2b   :  { %282 = vst [vmem:[#allocation2 + $0xd0] sm:$0xff] %v250_v15  ;;  %283 = vst [vmem:[#allocation2 + $0xd8] sm:$0xff] %v251_v16  ;;  %v254_v20 = vadd.f32 %v222_v17, %v190_v13  ;;  %v255_v21 = vadd.f32 %v223_v18, %v191_v14 }
  0x2c   :  { %284 = vst [vmem:[#allocation2 + $0xe0] sm:$0xff] %v252_v5  ;;  %285 = vst [vmem:[#allocation2 + $0xe8] sm:$0xff] %v253_v19 }
  0x2d   :  { %286 = vst [vmem:[#allocation2 + $0xf0] sm:$0xff] %v254_v20  ;;  %287 = vst [vmem:[#allocation2 + $0xf8] sm:$0xff] %v255_v21 }
  0x2e   :  { %399 = shalt.err (!%p396_p4)
}
  0x2f   :  { %s400_s6 = scalar_lea.hbm %s674_s4, 4096 }
  0x30   :  { %p401_p5 = scmp.ne.s32.totalorder %s674_s4, %s400_s6  ;;  %p404_p6 = scmp.lt.u32.totalorder %s400_s6, %s674_s4 }
  0x32   :  { %p406_p7 = pnand %p404_p6, %p401_p5 }
  0x34   :  { %409 = shalt.err (!%p406_p7)
}
  0x35   :  { %s413_s11 = smov 128   ;;  %s414_s12 = smov 8  }
  0x36   :  { %299 = dma.vmem_to_hbm [thread:$0]  %s294_s29, 4096, %s674_s4, [#allocation3], %s413_s11, %s413_s11, %s414_s12  }
  0x37   :  { %410 = dma.done.wait [#allocation3], 4096  }
  0x38   :  { %411 = vsyncadd [#allocation3], 4294963200 }
  0x39   :  { %303 = vsyncpa [#allocation3], 1 }

// kernel: sa_layer_single_head.2
= control target key start
LH: loop header
LB: loop body
LE: loop exit
PB: predicated region body
PF: predicated region fallthrough
CT: control target
= control target key end

     0   :  { %s2152_s18 = smov 0   ;;  %s2154_s19 = smov 0   ;;  %s2429_s0 = inlined_call_operand.vmem [shape: f32[2,128,128], index: 0, kind: input, shape index: {}]   ;;  %s2430_s1 = inlined_call_operand.vmem [shape: bf16[128,128], index: 1, kind: input, shape index: {}]   ;;  %s2431_s2 = inlined_call_operand.vmem [shape: bf16[128,128], index: 2, kind: input, shape index: {}]   ;;  %s2432_s3 = inlined_call_operand.vmem [shape: bf16[2,128,128], index: 3, kind: output, shape index: {0}]   ;;  %s2433_s4 = inlined_call_operand.vmem [shape: f32[2,1,128], index: 4, kind: output, shape index: {1}]   ;;  %s2434_s5 = inlined_call_operand.vmem [shape: f32[2,1,128], index: 5, kind: output, shape index: {2}]  }
   0x1   :  { %s2156_s20 = smov 0  }
   0x2 LB: > { %s28_s21 = sadd.s32 1, %s2114_s19  ;;  %p1663_p0 = scmp.ge.s32.totalorder %s2118_s20, 1  ;;  %s2118_s20 = sphi %s2156_s20, %s16_s20   ;;  %s2114_s19 = sphi %s2154_s19, %s2436_s19   ;;  %s2110_s18 = sphi %s2152_s18, %s2435_s18  }
   0x3   : > { %p30_p1 = scmp.ge.s32.totalorder %s28_s21, 2  ;;  %p204_p2 = scmp.lt.s32.totalorder %s2118_s20, 3 }
   0x5   : > { %s2438_s21 = smov (%p30_p1, %s28_s21), 0  ;;  %p205_p3 = pnand %p1663_p0, %p204_p2 }
   0x6   : > { %v2030_v0 = vld [vmem:[%s2430_s1] sm:$0xff] (!%p205_p3)   ;;  %p238_p4 = scmp.lt.s32.totalorder (!%p205_p3), %s2110_s18, 1  ;;  %v2031_v1 = vld [vmem:[%s2430_s1 + $0x8] sm:$0xff] (!%p205_p3)   ;;  %v2032_v2 = vld [vmem:[%s2430_s1 + $0x10] sm:$0xff] (!%p205_p3)   ;;  %vm2121_vm0 = vmmov (!%p205_p3), 0  }
   0x7   : > { %208 = sbr.rel (%p205_p3) target bundleno = 1687 (0x697), region = 32  ;;  %1840 = vmatprep.subr.bf16.mxu0 (!%p205_p3), %v2030_v0  ;;  %v2033_v3 = vld [vmem:[%s2430_s1 + $0x18] sm:$0xff] (!%p205_p3)   ;;  %v2034_v7 = vld [vmem:[%s2430_s1 + $0x20] sm:$0xff] (!%p205_p3)   ;;  %v2035_v8 = vld [vmem:[%s2430_s1 + $0x28] sm:$0xff] (!%p205_p3)  }
   0x8   : > { %1841 = vmatpush3.bf16.msra.mxu0 (!%p205_p3), %v2030_v0  ;;  %v2036_v10 = vld [vmem:[%s2430_s1 + $0x30] sm:$0xff] (!%p205_p3)   ;;  %v2037_v12 = vld [vmem:[%s2430_s1 + $0x38] sm:$0xff] (!%p205_p3)  }
   0x9   : > { %1842 = vmatprep.subr.bf16.mxu0 (!%p205_p3), %v2031_v1 }
   0xc   : > { %1843 = vmatpush3.bf16.msra.mxu0 (!%p205_p3), %v2031_v1 }
   0xd   : > { %1844 = vmatprep.subr.bf16.mxu0 (!%p205_p3), %v2032_v2 }
   0xe   : > { %s2440_s18 = smov (!%p238_p4, %s2110_s18), 1 }
   0xf   : > { %s1702_s28 = sshll.u32 %s2440_s18, 7  ;;  %s1703_s12 = sshll.u32 %s2440_s18, 6 }
  0x10   : > { %s2185_s6 = scalar_lea.vmem %s2429_s0, %s1702_s28  ;;  %1845 = vmatpush3.bf16.msra.mxu0 %v2032_v2  ;;  %s2402_s15 = scalar_lea.vmem %s2432_s3, %s1703_s12 }
  0x11   : > { %v2191_v4 = vld [vmem:[%s2185_s6] sm:$0xff]  ;;  %v2194_v5 = vld [vmem:[%s2185_s6 + $0x8] sm:$0xff]  ;;  %1846 = vmatprep.subr.bf16.mxu0 %v2033_v3  ;;  %v2207_v9 = vld [vmem:[%s2185_s6 + $0x10] sm:$0xff]  ;;  %s250_s22 = scalar_lea.vmem %s2433_s4, %s2440_s18  ;;  %s253_s25 = scalar_lea.vmem %s2434_s5, %s2440_s18 }
  0x12   : > { %v358_v6 = vpack.c.bf16 %v2194_v5, %v2191_v4  ;;  %275 = vxpose.xlu0.b32.start [1/16] %v2191_v4, 128  ;;  %v2214_v11 = vld [vmem:[%s2185_s6 + $0x18] sm:$0xff]  ;;  %v2221_v13 = vld [vmem:[%s2185_s6 + $0x20] sm:$0xff]  ;;  %v2225_v14 = vld [vmem:[%s2185_s6 + $0x28] sm:$0xff] }
  0x13   : > { %v359_v15 = vpack.c.bf16 %v2214_v11, %v2207_v9  ;;  %v360_v16 = vpack.c.bf16 %v2225_v14, %v2221_v13  ;;  %v2233_v17 = vld [vmem:[%s2185_s6 + $0x30] sm:$0xff]  ;;  %v2237_v18 = vld [vmem:[%s2185_s6 + $0x38] sm:$0xff]  ;;  %v2240_v19 = vld [vmem:[%s2185_s6 + $0x40] sm:$0xff] }
  0x14   : > { %1856 = vmatprep.mubr.bf16.mxu0 %v358_v6  ;;  %1847 = vmatpush3.bf16.msra.mxu0 %v2033_v3  ;;  %v2243_v20 = vld [vmem:[%s2185_s6 + $0x48] sm:$0xff]  ;;  %v361_v21 = vpack.c.bf16 %v2237_v18, %v2233_v17  ;;  %v2252_v23 = vld [vmem:[%s2185_s6 + $0x50] sm:$0xff]  ;;  %v2255_v24 = vld [vmem:[%s2185_s6 + $0x58] sm:$0xff] }
  0x15   : > { %1848 = vmatprep.subr.bf16.mxu0 %v2034_v7  ;;  %v362_v22 = vpack.c.bf16 %v2243_v20, %v2240_v19  ;;  %v2258_v25 = vld [vmem:[%s2185_s6 + $0x60] sm:$0xff]  ;;  %v2261_v26 = vld [vmem:[%s2185_s6 + $0x68] sm:$0xff]  ;;  %v363_v27 = vpack.c.bf16 %v2255_v24, %v2252_v23  ;;  %v2270_v29 = vld [vmem:[%s2185_s6 + $0x70] sm:$0xff] }
  0x16   : > { %276 = vxpose.xlu0.b32.cont [2/16] %v2194_v5, 128  ;;  %v364_v28 = vpack.c.bf16 %v2261_v26, %v2258_v25  ;;  %v2273_v30 = vld [vmem:[%s2185_s6 + $0x78] sm:$0xff] }
  0x17   : > { %v365_v31 = vpack.c.bf16 %v2273_v30, %v2270_v29 }
  0x18   : > { %1849 = vmatpush3.bf16.msra.mxu0 %v2034_v7 }
  0x19   : > { %1850 = vmatprep.subr.bf16.mxu0 %v2035_v8 }
  0x1a   : > { %277 = vxpose.xlu0.b32.cont [3/16] %v2207_v9, 128 }
  0x1c   : > { %1851 = vmatpush3.bf16.msra.mxu0 %v2035_v8 }
  0x1d   : > { %1852 = vmatprep.subr.bf16.mxu0 %v2036_v10 }
  0x1e   : > { %278 = vxpose.xlu0.b32.cont [4/16] %v2214_v11, 128 }
  0x20   : > { %1853 = vmatpush3.bf16.msra.mxu0 %v2036_v10 }
  0x21   : > { %1854 = vmatprep.subr.bf16.mxu0 %v2037_v12 }
  0x22   : > { %279 = vxpose.xlu0.b32.cont [5/16] %v2221_v13, 128 }
  0x24   : > { %1855 = vmatpush3.bf16.msra.mxu0 %v2037_v12 }
  0x26   : > { %280 = vxpose.xlu0.b32.cont [6/16] %v2225_v14, 128 }
  0x27   : > { %1857 = vmatmul.mubr.bf16.vlgmr.msra.gmra.mrb[0].mxu0 %v359_v15 }
  0x28   : > { %1860 = vmatprep.mubr.bf16.mxu0 %v360_v16 }
  0x2a   : > { %281 = vxpose.xlu0.b32.cont [7/16] %v2233_v17, 128 }
  0x2e   : > { %282 = vxpose.xlu0.b32.cont [8/16] %v2237_v18, 128 }
  0x2f   : > { %1861 = vmatmul.mubr.bf16.gmra.mrb[4].mxu0 %v361_v21 }
  0x30   : > { %1864 = vmatprep.mubr.bf16.mxu0 %v362_v22 }
  0x32   : > { %283 = vxpose.xlu0.b32.cont [9/16] %v2240_v19, 128 }
  0x36   : > { %284 = vxpose.xlu0.b32.cont [10/16] %v2243_v20, 128 }
  0x37   : > { %1865 = vmatmul.mubr.bf16.gmra.mrb[8].mxu0 %v363_v27 }
  0x38   : > { %1868 = vmatprep.mubr.bf16.mxu0 %v364_v28 }
  0x3a   : > { %285 = vxpose.xlu0.b32.cont [11/16] %v2252_v23, 128 }
  0x3e   : > { %286 = vxpose.xlu0.b32.cont [12/16] %v2255_v24, 128 }
  0x3f   : > { %1869 = vmatmul.mubr.bf16.gmra.mrb[12].mxu0 %v365_v31 }
  0x42   : > { %287 = vxpose.xlu0.b32.cont [13/16] %v2258_v25, 128 }
  0x46   : > { %288 = vxpose.xlu0.b32.cont [14/16] %v2261_v26, 128 }
  0x4a   : > { %289 = vxpose.xlu0.b32.cont [15/16] %v2270_v29, 128 }
  0x4e   : > { %290 = vxpose.xlu0.b32.end [16/16] %v2273_v30, 128 }
  0x92   : > { %v291_v32 = vpop.trf.xlu0 }
  0x96   : > { %v292_v33 = vpop.trf.xlu0 }
  0x97   : > { %v307_v34 = vpack.c.bf16 %v292_v33, %v291_v32 }
  0x99   : > { %1872 = vmatprep.subr.bf16.mxu1 %v307_v34 }
  0x9a   : > { %1873 = vmatpush3.bf16.msra.mxu1 %v307_v34  ;;  %v293_v35 = vpop.trf.xlu0 }
  0x9e   : > { %v294_v36 = vpop.trf.xlu0 }
  0x9f   : > { %v308_v37 = vpack.c.bf16 %v294_v36, %v293_v35 }
  0xa1   : > { %1874 = vmatprep.subr.bf16.mxu1 %v308_v37 }
  0xa2   : > { %1875 = vmatpush3.bf16.msra.mxu1 %v308_v37  ;;  %v295_v38 = vpop.trf.xlu0 }
  0xa6   : > { %v296_v39 = vpop.trf.xlu0 }
  0xa7   : > { %v309_v40 = vpack.c.bf16 %v296_v39, %v295_v38 }
  0xa9   : > { %1876 = vmatprep.subr.bf16.mxu1 %v309_v40 }
  0xaa   : > { %1877 = vmatpush3.bf16.msra.mxu1 %v309_v40  ;;  %v297_v41 = vpop.trf.xlu0 }
  0xae   : > { %v298_v42 = vpop.trf.xlu0 }
  0xaf   : > { %v310_v43 = vpack.c.bf16 %v298_v42, %v297_v41 }
  0xb1   : > { %1878 = vmatprep.subr.bf16.mxu1 %v310_v43 }
  0xb2   : > { %1879 = vmatpush3.bf16.msra.mxu1 %v310_v43  ;;  %v299_v44 = vpop.trf.xlu0 }
  0xb6   : > { %v300_v45 = vpop.trf.xlu0 }
  0xb7   : > { %v311_v46 = vpack.c.bf16 %v300_v45, %v299_v44 }
  0xb9   : > { %1880 = vmatprep.subr.bf16.mxu1 %v311_v46 }
  0xba   : > { %1881 = vmatpush3.bf16.msra.mxu1 %v311_v46  ;;  %v301_v47 = vpop.trf.xlu0 }
  0xbe   : > { %v302_v48 = vpop.trf.xlu0 }
  0xbf   : > { %v312_v49 = vpack.c.bf16 %v302_v48, %v301_v47  ;;  %v2120_v48 = vmov 0.0  }
  0xc0   : > { %1904 = vmatprep.subr.bf16.mxu0 %v2120_v48  ;;  %339 = vst [vmem:[#allocation4] sm:$0x1] %v2120_v48  ;;  %1920 = vmatprep.mubr.msk.bf16.mxu0 %vm2121_vm0, %v2120_v48 }
  0xc1   : > { %1882 = vmatprep.subr.bf16.mxu1 %v312_v49 }
  0xc2   : > { %1883 = vmatpush3.bf16.msra.mxu1 %v312_v49  ;;  %v303_v50 = vpop.trf.xlu0 }
  0xc6   : > { %v304_v51 = vpop.trf.xlu0 }
  0xc7   : > { %v313_v52 = vpack.c.bf16 %v304_v51, %v303_v50 }
  0xc9   : > { %1884 = vmatprep.subr.bf16.mxu1 %v313_v52 }
  0xca   : > { %1885 = vmatpush3.bf16.msra.mxu1 %v313_v52  ;;  %v305_v53 = vpop.trf.xlu0 }
  0xce   : > { %v306_v54 = vpop.trf.xlu0 }
  0xcf   : > { %v314_v55 = vpack.c.bf16 %v306_v54, %v305_v53 }
  0xd1   : > { %1886 = vmatprep.subr.bf16.mxu1 %v314_v55 }
  0xd2   : > { %1887 = vmatpush3.bf16.msra.mxu1 %v314_v55 }
  0xfa   : > { %v1858_v56 = vpop.f32.mrb[0].mxu0 }
  0xfb   : > { %v464_v57 = vpop.f32.mrb[1].mxu0 }
  0xfc   : > { %v1859_v58 = vpop.f32.mrb[2].mxu0 }
  0xfd   : > { %v528_v59 = vpack.c.bf16 %v1859_v58, %v1858_v56  ;;  %v467_v60 = vpop.f32.mrb[3].mxu0 }
  0xfe   : > { %v527_v61 = vpack.c.bf16 %v467_v60, %v464_v57 }
 0x100   : > { %1888 = vmatprep.mubr.bf16.mxu1 %v527_v61 }
 0x101   : > { %1889 = vmatmul.mubr.bf16.vlgmr.msra.gmra.mrb[0].mxu1 %v528_v59 }
 0x102   : > { %v1862_v62 = vpop.f32.mrb[4].mxu0 }
 0x103   : > { %v480_v63 = vpop.f32.mrb[5].mxu0 }
 0x104   : > { %v1863_v0 = vpop.f32.mrb[6].mxu0 }
 0x105   : > { %v530_v1 = vpack.c.bf16 %v1863_v0, %v1862_v62  ;;  %v483_v2 = vpop.f32.mrb[7].mxu0 }
 0x106   : > { %v529_v3 = vpack.c.bf16 %v483_v2, %v480_v63 }
 0x108   : > { %1892 = vmatprep.mubr.bf16.mxu1 %v529_v3 }
 0x109   : > { %1893 = vmatmul.mubr.bf16.gmra.mrb[4].mxu1 %v530_v1 }
 0x10a   : > { %v1866_v6 = vpop.f32.mrb[8].mxu0 }
 0x10b   : > { %v496_v7 = vpop.f32.mrb[9].mxu0 }
 0x10c   : > { %v1867_v8 = vpop.f32.mrb[10].mxu0 }
 0x10d   : > { %v532_v10 = vpack.c.bf16 %v1867_v8, %v1866_v6  ;;  %v499_v12 = vpop.f32.mrb[11].mxu0 }
 0x10e   : > { %v531_v15 = vpack.c.bf16 %v499_v12, %v496_v7 }
 0x110   : > { %1896 = vmatprep.mubr.bf16.mxu1 %v531_v15 }
 0x111   : > { %1897 = vmatmul.mubr.bf16.gmra.mrb[8].mxu1 %v532_v10 }
 0x112   : > { %v1870_v16 = vpop.f32.mrb[12].mxu0 }
 0x113   : > { %v512_v21 = vpop.f32.mrb[13].mxu0 }
 0x114   : > { %v1871_v22 = vpop.f32.mrb[14].mxu0 }
 0x115   : > { %v534_v27 = vpack.c.bf16 %v1871_v22, %v1870_v16  ;;  %v515_v28 = vpop.f32.mrb[15].mxu0 }
 0x116   : > { %v533_v31 = vpack.c.bf16 %v515_v28, %v512_v21 }
 0x118   : > { %1900 = vmatprep.mubr.bf16.mxu1 %v533_v31 }
 0x119   : > { %1901 = vmatmul.mubr.bf16.gmra.mrb[12].mxu1 %v534_v27 }
 0x1d4   : > { %v1890_v32 = vpop.f32.mrb[0].mxu1 }
 0x1d5   : > { %644 = vmax.xlane.f32.xlu1 %v1890_v32  ;;  %v577_v33 = vpop.f32.mrb[1].mxu1 }
 0x1d6   : > { %v1891_v34 = vpop.f32.mrb[2].mxu1 }
 0x1d7   : > { %v580_v35 = vpop.f32.mrb[3].mxu1 }
 0x1d9   : > { %640 = vmax.xlane.f32.xlu1 %v577_v33 }
 0x1dc   : > { %v1894_v36 = vpop.f32.mrb[4].mxu1 }
 0x1dd   : > { %646 = vmax.xlane.f32.xlu1 %v1891_v34  ;;  %v593_v37 = vpop.f32.mrb[5].mxu1 }
 0x1de   : > { %v1895_v38 = vpop.f32.mrb[6].mxu1 }
 0x1df   : > { %v596_v39 = vpop.f32.mrb[7].mxu1 }
 0x1e1   : > { %642 = vmax.xlane.f32.xlu1 %v580_v35 }
 0x1e4   : > { %v2282_v40 = vpop.f32.mrb[8].mxu1 }
 0x1e5   : > { %652 = vmax.xlane.f32.xlu1 %v1894_v36  ;;  %v2284_v41 = vpop.f32.mrb[9].mxu1 }
 0x1e6   : > { %v2286_v42 = vpop.f32.mrb[10].mxu1 }
 0x1e7   : > { %v2288_v43 = vpop.f32.mrb[11].mxu1 }
 0x1e9   : > { %648 = vmax.xlane.f32.xlu1 %v593_v37 }
 0x1ec   : > { %v2290_v44 = vpop.f32.mrb[12].mxu1 }
 0x1ed   : > { %654 = vmax.xlane.f32.xlu1 %v1895_v38  ;;  %v2292_v45 = vpop.f32.mrb[13].mxu1 }
 0x1ee   : > { %v2294_v46 = vpop.f32.mrb[14].mxu1 }
 0x1ef   : > { %v2296_v47 = vpop.f32.mrb[15].mxu1 }
 0x1f1   : > { %650 = vmax.xlane.f32.xlu1 %v596_v39 }
 0x1f5   : > { %660 = vmax.xlane.f32.xlu1 %v2282_v40 }
 0x1f9   : > { %656 = vmax.xlane.f32.xlu1 %v2284_v41 }
 0x1fd   : > { %662 = vmax.xlane.f32.xlu1 %v2286_v42 }
 0x201   : > { %658 = vmax.xlane.f32.xlu1 %v2288_v43 }
 0x205   : > { %668 = vmax.xlane.f32.xlu1 %v2290_v44 }
 0x209   : > { %664 = vmax.xlane.f32.xlu1 %v2292_v45 }
 0x20d   : > { %666 = vmax.xlane.f32.xlu1 %v2296_v47 }
 0x211   : > { %670 = vmax.xlane.f32.xlu1 %v2294_v46 }
 0x262   : > { %v645_v49 = vpop.xlane.xlu1 %644 }
 0x263   : > { %v674_v52 = vsub.f32 %v1890_v32, %v645_v49 }
 0x266   : > { %v641_v50 = vpop.xlane.xlu1 %640 }
 0x267   : > { %v672_v56 = vsub.f32 %v577_v33, %v641_v50 }
 0x26a   : > { %v647_v51 = vpop.xlane.xlu1 %646 }
 0x26b   : > { %v675_v53 = vsub.f32 %v1891_v34, %v647_v51 }
 0x26d   : > { %v689_v54 = vpack.c.bf16 %v675_v53, %v674_v52 }
 0x26e   : > { %v643_v55 = vpop.xlane.xlu1 %642 }
 0x26f   : > { %v700_v57 = vmul.bf16 1069105081, %v689_v54  ;;  %v673_v58 = vsub.f32 %v580_v35, %v643_v55 }
 0x271   : > { %2046 = vpow.bf16 %v700_v57  ;;  %v688_v59 = vpack.c.bf16 %v673_v58, %v672_v56 }
 0x272   : > { %v653_v60 = vpop.xlane.xlu1 %652 }
 0x273   : > { %v697_v61 = vmul.bf16 1069105081, %v688_v59  ;;  %v678_v0 = vsub.f32 %v1894_v36, %v653_v60 }
 0x275   : > { %2048 = vpow.bf16 %v697_v61 }
 0x276   : > { %v649_v62 = vpop.xlane.xlu1 %648 }
 0x277   : > { %v676_v8 = vsub.f32 %v593_v37, %v649_v62 }
 0x27a   : > { %v655_v63 = vpop.xlane.xlu1 %654 }
 0x27b   : > { %v679_v1 = vsub.f32 %v1895_v38, %v655_v63 }
 0x27c   : > { %v2047_v2 = vpop.eup %2046 }
 0x27d   : > { %v691_v3 = vpack.c.bf16 %v679_v1, %v678_v0  ;;  %v722_v6 = vunpack.c.l.bf16 %v2047_v2  ;;  %v723_v27 = vunpack.c.h.bf16 %v2047_v2 }
 0x27e   : > { %v651_v7 = vpop.xlane.xlu1 %650 }
 0x27f   : > { %v706_v10 = vmul.bf16 1069105081, %v691_v3  ;;  %v677_v12 = vsub.f32 %v596_v39, %v651_v7  ;;  %740 = vadd.xlane.f32.xlu1 %v722_v6 }
 0x280   : > { %v2049_v15 = vpop.eup %2048 }
 0x281   : > { %2050 = vpow.bf16 %v706_v10  ;;  %v690_v16 = vpack.c.bf16 %v677_v12, %v676_v8  ;;  %1905 = vmatpush3.bf16.msra.mxu0 %v2049_v15  ;;  %1924 = vmatprep.subr.bf16.mxu1 %v2049_v15  ;;  %v720_v21 = vunpack.c.l.bf16 %v2049_v15  ;;  %v721_v32 = vunpack.c.h.bf16 %v2049_v15 }
 0x282   : > { %1925 = vmatpush3.bf16.msra.mxu1 %v2049_v15  ;;  %v661_v22 = vpop.xlane.xlu1 %660  ;;  %1906 = vmatprep.subr.bf16.mxu0 %v2120_v48 }
 0x283   : > { %v703_v28 = vmul.bf16 1069105081, %v690_v16  ;;  %1926 = vmatprep.subr.bf16.mxu1 %v2047_v2  ;;  %736 = vadd.xlane.f32.xlu0 %v720_v21  ;;  %v682_v34 = vsub.f32 %v2282_v40, %v661_v22 }
 0x284   : > { %742 = vadd.xlane.f32.xlu1 %v723_v27 }
 0x285   : > { %2052 = vpow.bf16 %v703_v28  ;;  %1907 = vmatpush3.bf16.msra.mxu0 %v2047_v2 }
 0x286   : > { %1927 = vmatpush3.bf16.msra.mxu1 %v2047_v2  ;;  %v657_v31 = vpop.xlane.xlu1 %656  ;;  %1908 = vmatprep.subr.bf16.mxu0 %v2120_v48 }
 0x287   : > { %v680_v49 = vsub.f32 %v2284_v41, %v657_v31 }
 0x288   : > { %738 = vadd.xlane.f32.xlu1 %v721_v32 }
 0x28a   : > { %v663_v33 = vpop.xlane.xlu1 %662 }
 0x28b   : > { %v683_v35 = vsub.f32 %v2286_v42, %v663_v33 }
 0x28c   : > { %v2051_v36 = vpop.eup %2050 }
 0x28d   : > { %v693_v37 = vpack.c.bf16 %v683_v35, %v682_v34  ;;  %v726_v38 = vunpack.c.l.bf16 %v2051_v36  ;;  %v727_v54 = vunpack.c.h.bf16 %v2051_v36 }
 0x28e   : > { %v659_v39 = vpop.xlane.xlu1 %658 }
 0x28f   : > { %v712_v50 = vmul.bf16 1069105081, %v693_v37  ;;  %v681_v51 = vsub.f32 %v2288_v43, %v659_v39  ;;  %748 = vadd.xlane.f32.xlu1 %v726_v38 }
 0x290   : > { %v2053_v52 = vpop.eup %2052 }
 0x291   : > { %2054 = vpow.bf16 %v712_v50  ;;  %v692_v53 = vpack.c.bf16 %v681_v51, %v680_v49  ;;  %1909 = vmatpush3.bf16.msra.mxu0 %v2053_v52  ;;  %1928 = vmatprep.subr.bf16.mxu1 %v2053_v52  ;;  %v724_v41 = vunpack.c.l.bf16 %v2053_v52  ;;  %v725_v43 = vunpack.c.h.bf16 %v2053_v52 }
 0x292   : > { %1929 = vmatpush3.bf16.msra.mxu1 %v2053_v52  ;;  %v669_v40 = vpop.xlane.xlu1 %668  ;;  %1910 = vmatprep.subr.bf16.mxu0 %v2120_v48 }
 0x293   : > { %v709_v42 = vmul.bf16 1069105081, %v692_v53  ;;  %1930 = vmatprep.subr.bf16.mxu1 %v2051_v36  ;;  %750 = vadd.xlane.f32.xlu1 %v727_v54  ;;  %v686_v63 = vsub.f32 %v2290_v44, %v669_v40 }
 0x295   : > { %2056 = vpow.bf16 %v709_v42  ;;  %1911 = vmatpush3.bf16.msra.mxu0 %v2051_v36 }
 0x296   : > { %1931 = vmatpush3.bf16.msra.mxu1 %v2051_v36  ;;  %v665_v55 = vpop.xlane.xlu1 %664  ;;  %1912 = vmatprep.subr.bf16.mxu0 %v2120_v48 }
 0x297   : > { %744 = vadd.xlane.f32.xlu1 %v724_v41  ;;  %v684_v57 = vsub.f32 %v2292_v45, %v665_v55 }
 0x29a   : > { %v667_v56 = vpop.xlane.xlu1 %666 }
 0x29b   : > { %v685_v58 = vsub.f32 %v2296_v47, %v667_v56  ;;  %746 = vadd.xlane.f32.xlu1 %v725_v43 }
 0x29c   : > { %v2055_v59 = vpop.eup %2054 }
 0x29d   : > { %v694_v60 = vpack.c.bf16 %v685_v58, %v684_v57  ;;  %v730_v61 = vunpack.c.l.bf16 %v2055_v59  ;;  %v731_v6 = vunpack.c.h.bf16 %v2055_v59 }
 0x29e   : > { %v671_v62 = vpop.xlane.xlu1 %670 }
 0x29f   : > { %v715_v0 = vmul.bf16 1069105081, %v694_v60  ;;  %v687_v1 = vsub.f32 %v2294_v46, %v671_v62  ;;  %756 = vadd.xlane.f32.xlu1 %v730_v61 }
 0x2a0   : > { %v2057_v2 = vpop.eup %2056 }
 0x2a1   : > { %2058 = vpow.bf16 %v715_v0  ;;  %v695_v3 = vpack.c.bf16 %v687_v1, %v686_v63  ;;  %1913 = vmatpush3.bf16.msra.mxu0 %v2057_v2  ;;  %1932 = vmatprep.subr.bf16.mxu1 %v2057_v2  ;;  %v728_v47 = vunpack.c.l.bf16 %v2057_v2  ;;  %v729_v44 = vunpack.c.h.bf16 %v2057_v2 }
 0x2a2   : > { %1933 = vmatpush3.bf16.msra.mxu1 %v2057_v2  ;;  %1914 = vmatprep.subr.bf16.mxu0 %v2120_v48 }
 0x2a3   : > { %v718_v45 = vmul.bf16 1069105081, %v695_v3  ;;  %1934 = vmatprep.subr.bf16.mxu1 %v2055_v59  ;;  %758 = vadd.xlane.f32.xlu1 %v731_v6 }
 0x2a5   : > { %2060 = vpow.bf16 %v718_v45  ;;  %1915 = vmatpush3.bf16.msra.mxu0 %v2055_v59 }
 0x2a6   : > { %1935 = vmatpush3.bf16.msra.mxu1 %v2055_v59  ;;  %1916 = vmatprep.subr.bf16.mxu0 %v2120_v48 }
 0x2a7   : > { %752 = vadd.xlane.f32.xlu1 %v728_v47 }
 0x2ab   : > { %754 = vadd.xlane.f32.xlu1 %v729_v44 }
 0x2ac   : > { %v2059_v46 = vpop.eup %2058 }
 0x2ad   : > { %1917 = vmatpush3.bf16.msra.mxu0 %v2059_v46  ;;  %1936 = vmatprep.subr.bf16.mxu1 %v2059_v46  ;;  %v733_v12 = vunpack.c.h.bf16 %v2059_v46  ;;  %v732_v15 = vunpack.c.l.bf16 %v2059_v46 }
 0x2ae   : > { %1937 = vmatpush3.bf16.msra.mxu1 %v2059_v46  ;;  %1918 = vmatprep.subr.bf16.mxu0 %v2120_v48 }
 0x2b0   : > { %v2061_v7 = vpop.eup %2060 }
 0x2b1   : > { %1919 = vmatpush3.bf16.msra.mxu0 %v2061_v7  ;;  %1938 = vmatprep.subr.bf16.mxu1 %v2061_v7  ;;  %v735_v8 = vunpack.c.h.bf16 %v2061_v7  ;;  %v734_v10 = vunpack.c.l.bf16 %v2061_v7 }
 0x2b2   : > { %1939 = vmatpush3.bf16.msra.mxu1 %v2061_v7 }
 0x2b3   : > { %766 = vadd.xlane.f32.xlu0 %v735_v8  ;;  %764 = vadd.xlane.f32.xlu1 %v734_v10 }
 0x2b7   : > { %762 = vadd.xlane.f32.xlu0 %v733_v12  ;;  %760 = vadd.xlane.f32.xlu1 %v732_v15 }
 0x30c   : > { %v741_v16 = vpop.xlane.xlu1 %740 }
 0x310   : > { %v737_v21 = vpop.xlane.xlu0 %736 }
 0x311   : > { %2062 = vrcp.f32 %v737_v21  ;;  %v743_v22 = vpop.xlane.xlu1 %742 }
 0x315   : > { %v739_v27 = vpop.xlane.xlu1 %738 }
 0x316   : > { %2064 = vrcp.f32 %v739_v27 }
 0x317   : > { %2066 = vrcp.f32 %v741_v16 }
 0x318   : > { %2068 = vrcp.f32 %v743_v22 }
 0x31b   : > { %v2063_v28 = vpop.eup %2062 }
 0x31c   : > { %800 = vxpose.xlu1.b32.start [1/16] (narrow) %v2063_v28, 8  ;;  %v749_v31 = vpop.xlane.xlu1 %748  ;;  %v876_v32 = vmul.f32 %v2063_v28, %v2191_v4 }
 0x31e   : > { %892 = vxpose.xlu0.b32.start [1/16] %v876_v32, 128 }
 0x320   : > { %v2065_v33 = vpop.eup %2064  ;;  %v751_v34 = vpop.xlane.xlu1 %750 }
 0x321   : > { %801 = vxpose.xlu1.b32.cont [2/16] (narrow) %v2065_v33, 8  ;;  %v877_v35 = vmul.f32 %v2065_v33, %v2194_v5  ;;  %v2067_v36 = vpop.eup %2066 }
 0x322   : > { %v878_v38 = vmul.f32 %v2067_v36, %v2207_v9  ;;  %v2069_v39 = vpop.eup %2068 }
 0x323   : > { %893 = vxpose.xlu0.b32.cont [2/16] %v877_v35, 128  ;;  %v879_v50 = vmul.f32 %v2069_v39, %v2214_v11 }
 0x324   : > { %v745_v37 = vpop.xlane.xlu1 %744 }
 0x325   : > { %802 = vxpose.xlu1.b32.cont [3/16] (narrow) %v2067_v36, 8  ;;  %2070 = vrcp.f32 %v745_v37  ;;  %v2038_v36 = vld [vmem:[%s2431_s2] sm:$0xff]  }
 0x326   : > { %v2042_v37 = vld [vmem:[%s2431_s2 + $0x20] sm:$0xff]  }
 0x327   : > { %894 = vxpose.xlu0.b32.cont [3/16] %v878_v38, 128 }
 0x328   : > { %v747_v49 = vpop.xlane.xlu1 %746 }
 0x329   : > { %803 = vxpose.xlu1.b32.cont [4/16] (narrow) %v2069_v39, 8  ;;  %2072 = vrcp.f32 %v747_v49 }
 0x32a   : > { %2074 = vrcp.f32 %v749_v31 }
 0x32b   : > { %895 = vxpose.xlu0.b32.cont [4/16] %v879_v50, 128  ;;  %2076 = vrcp.f32 %v751_v34 }
 0x32c   : > { %v757_v51 = vpop.xlane.xlu1 %756 }
 0x32f   : > { %v2071_v52 = vpop.eup %2070 }
 0x330   : > { %804 = vxpose.xlu1.b32.cont [5/16] (narrow) %v2071_v52, 8  ;;  %v759_v53 = vpop.xlane.xlu1 %758  ;;  %v880_v48 = vmul.f32 %v2071_v52, %v2221_v13 }
 0x332   : > { %896 = vxpose.xlu0.b32.cont [5/16] %v880_v48, 128 }
 0x333   : > { %v2073_v54 = vpop.eup %2072 }
 0x334   : > { %805 = vxpose.xlu1.b32.cont [6/16] (narrow) %v2073_v54, 8  ;;  %v753_v40 = vpop.xlane.xlu1 %752  ;;  %v881_v42 = vmul.f32 %v2073_v54, %v2225_v14  ;;  %v2075_v41 = vpop.eup %2074 }
 0x335   : > { %2078 = vrcp.f32 %v753_v40  ;;  %v882_v43 = vmul.f32 %v2075_v41, %v2233_v17  ;;  %v2077_v56 = vpop.eup %2076 }
 0x336   : > { %897 = vxpose.xlu0.b32.cont [6/16] %v881_v42, 128  ;;  %v883_v57 = vmul.f32 %v2077_v56, %v2237_v18 }
 0x338   : > { %806 = vxpose.xlu1.b32.cont [7/16] (narrow) %v2075_v41, 8  ;;  %v755_v55 = vpop.xlane.xlu1 %754 }
 0x339   : > { %2080 = vrcp.f32 %v755_v55 }
 0x33a   : > { %898 = vxpose.xlu0.b32.cont [7/16] %v882_v43, 128  ;;  %2082 = vrcp.f32 %v757_v51  ;;  %v832_v51 = vld [vmem:[#allocation4] sm:$0x1] }
 0x33b   : > { %2084 = vrcp.f32 %v759_v53 }
 0x33c   : > { %807 = vxpose.xlu1.b32.cont [8/16] (narrow) %v2077_v56, 8 }
 0x33e   : > { %899 = vxpose.xlu0.b32.cont [8/16] %v883_v57, 128  ;;  %v1101_v57 = vlaneseq }
 0x33f   : > { %v2079_v58 = vpop.eup %2078 }
 0x340   : > { %v767_v59 = vpop.xlane.xlu0 %766  ;;  %808 = vxpose.xlu1.b32.cont [9/16] (narrow) %v2079_v58, 8  ;;  %v765_v60 = vpop.xlane.xlu1 %764  ;;  %v884_v61 = vmul.f32 %v2079_v58, %v2240_v19 }
 0x342   : > { %900 = vxpose.xlu0.b32.cont [9/16] %v884_v61, 128 }
 0x343   : > { %v2081_v62 = vpop.eup %2080 }
 0x344   : > { %809 = vxpose.xlu1.b32.cont [10/16] (narrow) %v2081_v62, 8  ;;  %v761_v63 = vpop.xlane.xlu1 %760  ;;  %v885_v0 = vmul.f32 %v2081_v62, %v2243_v20  ;;  %v2083_v1 = vpop.eup %2082 }
 0x345   : > { %v763_v2 = vpop.xlane.xlu0 %762  ;;  %2086 = vrcp.f32 %v761_v63  ;;  %v886_v3 = vmul.f32 %v2083_v1, %v2252_v23  ;;  %v2085_v6 = vpop.eup %2084 }
 0x346   : > { %901 = vxpose.xlu0.b32.cont [10/16] %v885_v0, 128  ;;  %2088 = vrcp.f32 %v763_v2  ;;  %v887_v45 = vmul.f32 %v2085_v6, %v2255_v24 }
 0x347   : > { %2090 = vrcp.f32 %v765_v60  ;;  %v1102_v60 = vshrl.u32 %v1101_v57, 7 }
 0x348   : > { %810 = vxpose.xlu1.b32.cont [11/16] (narrow) %v2083_v1, 8  ;;  %2092 = vrcp.f32 %v767_v59 }
 0x349   : > { %v1103_v0 = vsub.s32 0, %v1102_v60 }
 0x34a   : > { %902 = vxpose.xlu0.b32.cont [11/16] %v886_v3, 128 }
 0x34c   : > { %811 = vxpose.xlu1.b32.cont [12/16] (narrow) %v2085_v6, 8 }
 0x34e   : > { %903 = vxpose.xlu0.b32.cont [12/16] %v887_v45, 128 }
 0x34f   : > { %v2087_v47 = vpop.eup %2086 }
 0x350   : > { %812 = vxpose.xlu1.b32.cont [13/16] (narrow) %v2087_v47, 8  ;;  %v888_v44 = vmul.f32 %v2087_v47, %v2258_v25  ;;  %v2089_v46 = vpop.eup %2088 }
 0x351   : > { %v889_v7 = vmul.f32 %v2089_v46, %v2261_v26  ;;  %v2091_v8 = vpop.eup %2090 }
 0x352   : > { %904 = vxpose.xlu0.b32.cont [13/16] %v888_v44, 128  ;;  %v890_v10 = vmul.f32 %v2091_v8, %v2270_v29  ;;  %v2093_v12 = vpop.eup %2092 }
 0x353   : > { %v891_v15 = vmul.f32 %v2093_v12, %v2273_v30 }
 0x354   : > { %813 = vxpose.xlu1.b32.cont [14/16] (narrow) %v2089_v46, 8 }
 0x356   : > { %905 = vxpose.xlu0.b32.cont [14/16] %v889_v7, 128 }
 0x358   : > { %814 = vxpose.xlu1.b32.cont [15/16] (narrow) %v2091_v8, 8 }
 0x35a   : > { %906 = vxpose.xlu0.b32.cont [15/16] %v890_v10, 128 }
 0x35c   : > { %815 = vxpose.xlu1.b32.end [16/16] (narrow) %v2093_v12, 8 }
 0x35e   : > { %907 = vxpose.xlu0.b32.end [16/16] %v891_v15, 128 }
 0x362   : > { %1138 = vxpose.xlu0.b32.start [1/16] %v2191_v4, 128 }
 0x366   : > { %1139 = vxpose.xlu0.b32.cont [2/16] %v2194_v5, 128 }
 0x36a   : > { %1140 = vxpose.xlu0.b32.cont [3/16] %v2207_v9, 128 }
 0x36e   : > { %1141 = vxpose.xlu0.b32.cont [4/16] %v2214_v11, 128 }
 0x372   : > { %1142 = vxpose.xlu0.b32.cont [5/16] %v2221_v13, 128 }
 0x376   : > { %1143 = vxpose.xlu0.b32.cont [6/16] %v2225_v14, 128 }
 0x37a   : > { %1144 = vxpose.xlu0.b32.cont [7/16] %v2233_v17, 128 }
 0x37e   : > { %1145 = vxpose.xlu0.b32.cont [8/16] %v2237_v18, 128 }
 0x382   : > { %1146 = vxpose.xlu0.b32.cont [9/16] %v2240_v19, 128 }
 0x386   : > { %1147 = vxpose.xlu0.b32.cont [10/16] %v2243_v20, 128 }
 0x38a   : > { %1148 = vxpose.xlu0.b32.cont [11/16] %v2252_v23, 128 }
 0x38e   : > { %1149 = vxpose.xlu0.b32.cont [12/16] %v2255_v24, 128 }
 0x392   : > { %1150 = vxpose.xlu0.b32.cont [13/16] %v2258_v25, 128 }
 0x396   : > { %1151 = vxpose.xlu0.b32.cont [14/16] %v2261_v26, 128 }
 0x39a   : > { %1152 = vxpose.xlu0.b32.cont [15/16] %v2270_v29, 128 }
 0x39e   : > { %1153 = vxpose.xlu0.b32.end [16/16] %v2273_v30, 128 }
 0x3a0   : > { %v816_v4 = vpop.trf.xlu1 }
 0x3a1   : > { %v833_v5 = vpack.c.bf16 %v816_v4, %v816_v4 }
 0x3a2   : > { %v908_v9 = vpop.trf.xlu0 }
 0x3a3   : > { %1921 = vmatmul.mubr.bf16.vlgmr.msra.gmra.mrb[16].mxu0 %v833_v5 }
 0x3a4   : > { %1972 = vmatprep.mubr.bf16.mxu0 %v2038_v36 }
 0x3a6   : > { %v909_v11 = vpop.trf.xlu0 }
 0x3a7   : > { %v924_v13 = vpack.c.bf16 %v909_v11, %v908_v9 }
 0x3a9   : > { %1940 = vmatprep.mubr.bf16.mxu1 %v924_v13 }
 0x3aa   : > { %v910_v14 = vpop.trf.xlu0 }
 0x3ae   : > { %v911_v17 = vpop.trf.xlu0 }
 0x3af   : > { %v925_v18 = vpack.c.bf16 %v911_v17, %v910_v14 }
 0x3b1   : > { %1941 = vmatmul.mubr.bf16.vlgmr.msra.gmra.mrb[16].mxu1 %v925_v18 }
 0x3b2   : > { %v912_v19 = vpop.trf.xlu0 }
 0x3b6   : > { %v913_v20 = vpop.trf.xlu0 }
 0x3b7   : > { %v926_v23 = vpack.c.bf16 %v913_v20, %v912_v19 }
 0x3b9   : > { %1944 = vmatprep.mubr.bf16.mxu1 %v926_v23 }
 0x3ba   : > { %v914_v24 = vpop.trf.xlu0 }
 0x3be   : > { %v915_v25 = vpop.trf.xlu0 }
 0x3bf   : > { %v927_v26 = vpack.c.bf16 %v915_v25, %v914_v24 }
 0x3c1   : > { %1945 = vmatmul.mubr.bf16.gmra.mrb[20].mxu1 %v927_v26 }
 0x3c2   : > { %v916_v29 = vpop.trf.xlu0 }
 0x3c6   : > { %v917_v30 = vpop.trf.xlu0 }
 0x3c7   : > { %v928_v16 = vpack.c.bf16 %v917_v30, %v916_v29 }
 0x3c9   : > { %1948 = vmatprep.mubr.bf16.mxu1 %v928_v16 }
 0x3ca   : > { %v918_v21 = vpop.trf.xlu0 }
 0x3ce   : > { %v919_v22 = vpop.trf.xlu0 }
 0x3cf   : > { %v929_v27 = vpack.c.bf16 %v919_v22, %v918_v21 }
 0x3d1   : > { %1949 = vmatmul.mubr.bf16.gmra.mrb[24].mxu1 %v929_v27 }
 0x3d2   : > { %v920_v28 = vpop.trf.xlu0 }
 0x3d6   : > { %v921_v31 = vpop.trf.xlu0 }
 0x3d7   : > { %v930_v32 = vpack.c.bf16 %v921_v31, %v920_v28 }
 0x3d9   : > { %1952 = vmatprep.mubr.bf16.mxu1 %v930_v32 }
 0x3da   : > { %v922_v33 = vpop.trf.xlu0 }
 0x3de   : > { %v923_v34 = vpop.trf.xlu0 }
 0x3df   : > { %v931_v35 = vpack.c.bf16 %v923_v34, %v922_v33 }
 0x3e1   : > { %1953 = vmatmul.mubr.bf16.gmra.mrb[28].mxu1 %v931_v35 }
 0x3e2   : > { %1980 = vmatprep.mubr.bf16.mxu1 %v2042_v37  ;;  %v1154_v38 = vpop.trf.xlu0 }
 0x3e6   : > { %v1155_v39 = vpop.trf.xlu0 }
 0x3ea   : > { %v1156_v49 = vpop.trf.xlu0 }
 0x3ee   : > { %v1157_v50 = vpop.trf.xlu0 }
 0x3f2   : > { %v1158_v52 = vpop.trf.xlu0 }
 0x3f6   : > { %v1159_v41 = vpop.trf.xlu0 }
 0x3fa   : > { %v1160_v43 = vpop.trf.xlu0 }
 0x3fe   : > { %v1161_v62 = vpop.trf.xlu0 }
 0x402   : > { %v1162_v1 = vpop.trf.xlu0 }
 0x406   : > { %v1163_v12 = vpop.trf.xlu0 }
 0x40a   : > { %v1164_v20 = vpop.trf.xlu0 }
 0x40e   : > { %v1165_v16 = vpop.trf.xlu0 }
 0x412   : > { %v1166_v22 = vpop.trf.xlu0 }
 0x476   : > { %v868_v53 = vpop.f32.mrb[16].mxu0 }
 0x477   : > { %v874_v48 = vadd.f32 %v868_v53, %v832_v51  ;;  %v1922_v54 = vpop.f32.mrb[17].mxu0 }
 0x478   : > { %v871_v40 = vpop.f32.mrb[18].mxu0 }
 0x479   : > { %875 = vst [vmem:[#allocation4] sm:$0x1] %v874_v48  ;;  %v1923_v42 = vpop.f32.mrb[19].mxu0 }
 0x480   : > { %v1080_v55 = vld [vmem:[#allocation4] sm:$0x1] }
 0x481   : > { %v1081_v56 = vadd.f32 1e-06, %v1080_v55 }
 0x483   : > { %2094 = vrcp.f32 %v1081_v56 }
 0x484   : > { %v1942_v58 = vpop.f32.mrb[16].mxu1 }
 0x485   : > { %v982_v59 = vpop.f32.mrb[17].mxu1 }
 0x486   : > { %v1943_v61 = vpop.f32.mrb[18].mxu1 }
 0x487   : > { %v985_v63 = vpop.f32.mrb[19].mxu1 }
 0x48d   : > { %v2095_v2 = vpop.eup %2094 }
 0x48e   : > { %v2362_v3 = vrot.slane %v2095_v2, %v1103_v0  ;;  %v2043_v0 = vld [vmem:[%s2431_s2 + $0x28] sm:$0xff]   ;;  %v2044_v2 = vld [vmem:[%s2431_s2 + $0x30] sm:$0xff]  }
 0x490   : > { %v1108_v6 = vmul.f32 %v1942_v58, %v2362_v3  ;;  %v1106_v45 = vmul.f32 %v2362_v3, %v982_v59  ;;  %v1109_v47 = vmul.f32 %v1943_v61, %v2362_v3  ;;  %v1107_v44 = vmul.f32 %v2362_v3, %v985_v63  ;;  %v2039_v63 = vld [vmem:[%s2431_s2 + $0x8] sm:$0xff]  }
 0x492   : > { %v1172_v46 = vsub.f32 %v1156_v49, %v1108_v6  ;;  %v1170_v7 = vsub.f32 %v1154_v38, %v1106_v45  ;;  %v1171_v8 = vsub.f32 %v1155_v39, %v1107_v44  ;;  %v1173_v10 = vsub.f32 %v1157_v50, %v1109_v47  ;;  %v1167_v49 = vpop.trf.xlu0  ;;  %v2045_v6 = vld [vmem:[%s2431_s2 + $0x38] sm:$0xff]  }
 0x494   : > { %v1202_v15 = vpack.c.bf16 %v1171_v8, %v1170_v7  ;;  %v1203_v4 = vpack.c.bf16 %v1173_v10, %v1172_v46  ;;  %v1946_v5 = vpop.f32.mrb[20].mxu1 }
 0x495   : > { %v1112_v9 = vmul.f32 %v1946_v5, %v2362_v3  ;;  %v998_v11 = vpop.f32.mrb[21].mxu1 }
 0x496   : > { %v1110_v13 = vmul.f32 %v2362_v3, %v998_v11  ;;  %v1947_v14 = vpop.f32.mrb[22].mxu1  ;;  %1956 = vmatprep.subr.bf16.mxu0 %v1202_v15  ;;  %1988 = vmatprep.subr.bf16.mxu1 %v1202_v15 }
 0x497   : > { %v1113_v17 = vmul.f32 %v1947_v14, %v2362_v3  ;;  %v1001_v18 = vpop.f32.mrb[23].mxu1  ;;  %1957 = vmatpush3.bf16.msra.mxu0 %v1202_v15  ;;  %1996 = vmatpush3.bf16.msra.mxu1 %v1202_v15  ;;  %v1176_v23 = vsub.f32 %v1160_v43, %v1112_v9 }
 0x498   : > { %v1111_v19 = vmul.f32 %v2362_v3, %v1001_v18  ;;  %1958 = vmatprep.subr.bf16.mxu0 %v1203_v4  ;;  %1989 = vmatprep.subr.bf16.mxu1 %v1203_v4  ;;  %v1174_v25 = vsub.f32 %v1158_v52, %v1110_v13  ;;  %v1168_v52 = vpop.trf.xlu0 }
 0x499   : > { %v1177_v24 = vsub.f32 %v1161_v62, %v1113_v17 }
 0x49a   : > { %v1175_v26 = vsub.f32 %v1159_v41, %v1111_v19 }
 0x49b   : > { %v1205_v29 = vpack.c.bf16 %v1177_v24, %v1176_v23  ;;  %1959 = vmatpush3.bf16.msra.mxu0 %v1203_v4  ;;  %1997 = vmatpush3.bf16.msra.mxu1 %v1203_v4 }
 0x49c   : > { %v1204_v30 = vpack.c.bf16 %v1175_v26, %v1174_v25  ;;  %v1169_v41 = vpop.trf.xlu0 }
 0x49e   : > { %1960 = vmatprep.subr.bf16.mxu0 %v1204_v30  ;;  %1990 = vmatprep.subr.bf16.mxu1 %v1204_v30 }
 0x49f   : > { %1961 = vmatpush3.bf16.msra.mxu0 %v1204_v30  ;;  %1998 = vmatpush3.bf16.msra.mxu1 %v1204_v30 }
 0x4a0   : > { %1962 = vmatprep.subr.bf16.mxu0 %v1205_v29  ;;  %1991 = vmatprep.subr.bf16.mxu1 %v1205_v29 }
 0x4a3   : > { %1963 = vmatpush3.bf16.msra.mxu0 %v1205_v29  ;;  %1999 = vmatpush3.bf16.msra.mxu1 %v1205_v29 }
 0x4a4   : > { %v1950_v21 = vpop.f32.mrb[24].mxu1 }
 0x4a5   : > { %v1116_v27 = vmul.f32 %v1950_v21, %v2362_v3  ;;  %v1014_v28 = vpop.f32.mrb[25].mxu1 }
 0x4a6   : > { %v1114_v31 = vmul.f32 %v2362_v3, %v1014_v28  ;;  %v1951_v32 = vpop.f32.mrb[26].mxu1 }
 0x4a7   : > { %v1117_v33 = vmul.f32 %v1951_v32, %v2362_v3  ;;  %v1017_v34 = vpop.f32.mrb[27].mxu1  ;;  %v1180_v36 = vsub.f32 %v1164_v20, %v1116_v27 }
 0x4a8   : > { %v1115_v35 = vmul.f32 %v2362_v3, %v1017_v34  ;;  %v1178_v38 = vsub.f32 %v1162_v1, %v1114_v31  ;;  %v2040_v1 = vld [vmem:[%s2431_s2 + $0x10] sm:$0xff]  }
 0x4a9   : > { %v1181_v37 = vsub.f32 %v1165_v16, %v1117_v33 }
 0x4aa   : > { %v1179_v39 = vsub.f32 %v1163_v12, %v1115_v35 }
 0x4ab   : > { %v1207_v50 = vpack.c.bf16 %v1181_v37, %v1180_v36 }
 0x4ac   : > { %v1206_v51 = vpack.c.bf16 %v1179_v39, %v1178_v38 }
 0x4ae   : > { %1964 = vmatprep.subr.bf16.mxu0 %v1206_v51  ;;  %1992 = vmatprep.subr.bf16.mxu1 %v1206_v51 }
 0x4af   : > { %1965 = vmatpush3.bf16.msra.mxu0 %v1206_v51  ;;  %2000 = vmatpush3.bf16.msra.mxu1 %v1206_v51 }
 0x4b0   : > { %1966 = vmatprep.subr.bf16.mxu0 %v1207_v50  ;;  %1993 = vmatprep.subr.bf16.mxu1 %v1207_v50 }
 0x4b3   : > { %1967 = vmatpush3.bf16.msra.mxu0 %v1207_v50  ;;  %2001 = vmatpush3.bf16.msra.mxu1 %v1207_v50 }
 0x4b4   : > { %v1954_v53 = vpop.f32.mrb[28].mxu1 }
 0x4b5   : > { %v1120_v48 = vmul.f32 %v1954_v53, %v2362_v3  ;;  %v1030_v54 = vpop.f32.mrb[29].mxu1 }
 0x4b6   : > { %v1118_v40 = vmul.f32 %v2362_v3, %v1030_v54  ;;  %v1955_v42 = vpop.f32.mrb[30].mxu1 }
 0x4b7   : > { %v1121_v55 = vmul.f32 %v1955_v42, %v2362_v3  ;;  %v1033_v43 = vpop.f32.mrb[31].mxu1  ;;  %v1184_v57 = vsub.f32 %v1168_v52, %v1120_v48 }
 0x4b8   : > { %v1119_v56 = vmul.f32 %v2362_v3, %v1033_v43  ;;  %v1182_v59 = vsub.f32 %v1166_v22, %v1118_v40  ;;  %v2041_v3 = vld [vmem:[%s2431_s2 + $0x18] sm:$0xff]  }
 0x4b9   : > { %v1185_v58 = vsub.f32 %v1169_v41, %v1121_v55 }
 0x4ba   : > { %v1183_v60 = vsub.f32 %v1167_v49, %v1119_v56 }
 0x4bb   : > { %v1209_v61 = vpack.c.bf16 %v1185_v58, %v1184_v57 }
 0x4bc   : > { %v1208_v62 = vpack.c.bf16 %v1183_v60, %v1182_v59 }
 0x4be   : > { %1968 = vmatprep.subr.bf16.mxu0 %v1208_v62  ;;  %1994 = vmatprep.subr.bf16.mxu1 %v1208_v62 }
 0x4bf   : > { %1969 = vmatpush3.bf16.msra.mxu0 %v1208_v62  ;;  %2002 = vmatpush3.bf16.msra.mxu1 %v1208_v62 }
 0x4c0   : > { %1970 = vmatprep.subr.bf16.mxu0 %v1209_v61  ;;  %1995 = vmatprep.subr.bf16.mxu1 %v1209_v61 }
 0x4c3   : > { %1971 = vmatpush3.bf16.msra.mxu0 %v1209_v61  ;;  %2003 = vmatpush3.bf16.msra.mxu1 %v1209_v61 }
 0x4c6   : > { %1973 = vmatmul.mubr.bf16.vlgmr.msra.gmra.mrb[20].mxu0 %v2039_v63  ;;  %1981 = vmatmul.mubr.bf16.vlgmr.msra.gmra.mrb[32].mxu1 %v2043_v0 }
 0x4c7   : > { %1976 = vmatprep.mubr.bf16.mxu0 %v2040_v1  ;;  %1984 = vmatprep.mubr.bf16.mxu1 %v2044_v2 }
 0x4ce   : > { %1977 = vmatmul.mubr.bf16.gmra.mrb[24].mxu0 %v2041_v3  ;;  %1985 = vmatmul.mubr.bf16.gmra.mrb[36].mxu1 %v2045_v6 }
 0x599   : > { %v1974_v45 = vpop.f32.mrb[20].mxu0  ;;  %v1982_v47 = vpop.f32.mrb[32].mxu1 }
 0x59a   : > { %v1292_v44 = vpop.f32.mrb[21].mxu0  ;;  %v1324_v46 = vpop.f32.mrb[33].mxu1 }
 0x59b   : > { %1355 = vxpose.xlu1.b32.start [1/16] %v1292_v44, 128  ;;  %v1975_v7 = vpop.f32.mrb[22].mxu0  ;;  %v1983_v8 = vpop.f32.mrb[34].mxu1 }
 0x59c   : > { %v1295_v10 = vpop.f32.mrb[23].mxu0  ;;  %v1327_v12 = vpop.f32.mrb[35].mxu1 }
 0x59f   : > { %1356 = vxpose.xlu1.b32.cont [2/16] %v1295_v10, 128 }
 0x5a1   : > { %v1978_v15 = vpop.f32.mrb[24].mxu0  ;;  %v1986_v4 = vpop.f32.mrb[36].mxu1 }
 0x5a2   : > { %v1308_v5 = vpop.f32.mrb[25].mxu0  ;;  %v1340_v9 = vpop.f32.mrb[37].mxu1 }
 0x5a3   : > { %1357 = vxpose.xlu1.b32.cont [3/16] %v1974_v45, 128  ;;  %v1979_v11 = vpop.f32.mrb[26].mxu0  ;;  %v1987_v13 = vpop.f32.mrb[38].mxu1 }
 0x5a4   : > { %v1311_v14 = vpop.f32.mrb[27].mxu0  ;;  %v1343_v17 = vpop.f32.mrb[39].mxu1 }
 0x5a7   : > { %1358 = vxpose.xlu1.b32.cont [4/16] %v1975_v7, 128 }
 0x5ab   : > { %1359 = vxpose.xlu1.b32.cont [5/16] %v1308_v5, 128 }
 0x5af   : > { %1360 = vxpose.xlu1.b32.cont [6/16] %v1311_v14, 128 }
 0x5b3   : > { %1361 = vxpose.xlu1.b32.cont [7/16] %v1978_v15, 128 }
 0x5b7   : > { %1362 = vxpose.xlu1.b32.cont [8/16] %v1979_v11, 128 }
 0x5bb   : > { %1363 = vxpose.xlu1.b32.cont [9/16] %v1324_v46, 128 }
 0x5bf   : > { %1364 = vxpose.xlu1.b32.cont [10/16] %v1327_v12, 128 }
 0x5c3   : > { %1365 = vxpose.xlu1.b32.cont [11/16] %v1982_v47, 128 }
 0x5c7   : > { %1366 = vxpose.xlu1.b32.cont [12/16] %v1983_v8, 128 }
 0x5cb   : > { %1367 = vxpose.xlu1.b32.cont [13/16] %v1340_v9, 128 }
 0x5cf   : > { %1368 = vxpose.xlu1.b32.cont [14/16] %v1343_v17, 128 }
 0x5d3   : > { %1369 = vxpose.xlu1.b32.cont [15/16] %v1986_v4, 128 }
 0x5d7   : > { %1370 = vxpose.xlu1.b32.end [16/16] %v1987_v13, 128 }
 0x61b   : > { %v1371_v18 = vpop.trf.xlu1 }
 0x61f   : > { %v1372_v19 = vpop.trf.xlu1 }
 0x620   : > { %v1723_v20 = vpack.c.bf16 %v1372_v19, %v1371_v18  ;;  %v1387_v28 = vadd.f32 %v1372_v19, %v1371_v18 }
 0x622   : > { %1724 = vst [vmem:[%s2402_s15] sm:$0xff] %v1723_v20  }
 0x623   : > { %v1373_v23 = vpop.trf.xlu1 }
 0x624   : > { %v1388_v31 = vadd.f32 %v1387_v28, %v1373_v23 }
 0x627   : > { %v1374_v24 = vpop.trf.xlu1 }
 0x628   : > { %v1728_v25 = vpack.c.bf16 %v1374_v24, %v1373_v23  ;;  %v1389_v33 = vadd.f32 %v1388_v31, %v1374_v24 }
 0x62a   : > { %1760 = vst [vmem:[%s2402_s15 + $0x8] sm:$0xff] %v1728_v25  }
 0x62b   : > { %v1375_v26 = vpop.trf.xlu1 }
 0x62c   : > { %v1390_v35 = vadd.f32 %v1389_v33, %v1375_v26 }
 0x62f   : > { %v1376_v29 = vpop.trf.xlu1 }
 0x630   : > { %v1733_v30 = vpack.c.bf16 %v1376_v29, %v1375_v26  ;;  %v1391_v37 = vadd.f32 %v1390_v35, %v1376_v29 }
 0x632   : > { %1761 = vst [vmem:[%s2402_s15 + $0x10] sm:$0xff] %v1733_v30  }
 0x633   : > { %v1377_v16 = vpop.trf.xlu1 }
 0x634   : > { %v1392_v38 = vadd.f32 %v1391_v37, %v1377_v16 }
 0x637   : > { %v1378_v21 = vpop.trf.xlu1 }
 0x638   : > { %v1738_v22 = vpack.c.bf16 %v1378_v21, %v1377_v16  ;;  %v1393_v49 = vadd.f32 %v1392_v38, %v1378_v21 }
 0x63a   : > { %1762 = vst [vmem:[%s2402_s15 + $0x18] sm:$0xff] %v1738_v22  }
 0x63b   : > { %v1379_v27 = vpop.trf.xlu1 }
 0x63c   : > { %v1394_v51 = vadd.f32 %v1393_v49, %v1379_v27 }
 0x63f   : > { %v1380_v32 = vpop.trf.xlu1 }
 0x640   : > { %v1743_v34 = vpack.c.bf16 %v1380_v32, %v1379_v27  ;;  %v1395_v53 = vadd.f32 %v1394_v51, %v1380_v32 }
 0x642   : > { %1763 = vst [vmem:[%s2402_s15 + $0x20] sm:$0xff] %v1743_v34  }
 0x643   : > { %v1381_v36 = vpop.trf.xlu1 }
 0x644   : > { %v1396_v48 = vadd.f32 %v1395_v53, %v1381_v36 }
 0x647   : > { %v1382_v39 = vpop.trf.xlu1 }
 0x648   : > { %v1748_v50 = vpack.c.bf16 %v1382_v39, %v1381_v36  ;;  %v1397_v40 = vadd.f32 %v1396_v48, %v1382_v39 }
 0x64a   : > { %1764 = vst [vmem:[%s2402_s15 + $0x28] sm:$0xff] %v1748_v50  }
 0x64b   : > { %v1383_v52 = vpop.trf.xlu1 }
 0x64c   : > { %v1398_v41 = vadd.f32 %v1397_v40, %v1383_v52 }
 0x64f   : > { %v1384_v54 = vpop.trf.xlu1 }
 0x650   : > { %v1753_v42 = vpack.c.bf16 %v1384_v54, %v1383_v52  ;;  %v1399_v43 = vadd.f32 %v1398_v41, %v1384_v54 }
 0x652   : > { %1765 = vst [vmem:[%s2402_s15 + $0x30] sm:$0xff] %v1753_v42  }
 0x653   : > { %v1385_v55 = vpop.trf.xlu1 }
 0x654   : > { %v1400_v56 = vadd.f32 %v1399_v43, %v1385_v55 }
 0x657   : > { %v1386_v57 = vpop.trf.xlu1 }
 0x658   : > { %v1401_v58 = vadd.f32 %v1400_v56, %v1386_v57  ;;  %v1758_v59 = vpack.c.bf16 %v1386_v57, %v1385_v55 }
 0x65a   : > { %v1402_v60 = vrot.slane %v1401_v58, 4  ;;  %1766 = vst [vmem:[%s2402_s15 + $0x38] sm:$0xff] %v1758_v59  }
 0x65c   : > { %v1403_v61 = vadd.f32 %v1402_v60, %v1401_v58 }
 0x65e   : > { %v1404_v62 = vrot.slane %v1403_v61, 2 }
 0x660   : > { %v1405_v63 = vadd.f32 %v1404_v62, %v1403_v61 }
 0x662   : > { %v1406_v0 = vrot.slane %v1405_v63, 1 }
 0x664   : > { %v1407_v1 = vadd.f32 %v1406_v0, %v1405_v63 }
 0x666   : > { %v1408_v2 = vmul.f32 0.0078125, %v1407_v1  ;;  %1425 = vst [vmem:[%s250_s22] sm:$0x1] %v1407_v1 }
 0x668   : > { %v1409_v3 = vsub.f32 %v1371_v18, %v1408_v2  ;;  %v1410_v6 = vsub.f32 %v1372_v19, %v1408_v2  ;;  %v1411_v45 = vsub.f32 %v1373_v23, %v1408_v2  ;;  %v1412_v46 = vsub.f32 %v1374_v24, %v1408_v2 }
 0x669   : > { %v1413_v7 = vsub.f32 %v1375_v26, %v1408_v2  ;;  %v1414_v12 = vsub.f32 %v1376_v29, %v1408_v2  ;;  %v1415_v5 = vsub.f32 %v1377_v16, %v1408_v2  ;;  %v1416_v13 = vsub.f32 %v1378_v21, %v1408_v2 }
 0x66a   : > { %v1426_v47 = vmul.f32 %v1409_v3, %v1409_v3  ;;  %v1427_v44 = vmul.f32 %v1410_v6, %v1410_v6  ;;  %v1428_v8 = vmul.f32 %v1411_v45, %v1411_v45  ;;  %v1429_v15 = vmul.f32 %v1412_v46, %v1412_v46 }
 0x66b   : > { %v1430_v9 = vmul.f32 %v1413_v7, %v1413_v7  ;;  %v1431_v14 = vmul.f32 %v1414_v12, %v1414_v12  ;;  %v1417_v20 = vsub.f32 %v1379_v27, %v1408_v2  ;;  %v1432_v25 = vmul.f32 %v1415_v5, %v1415_v5 }
 0x66c   : > { %v1442_v10 = vadd.f32 %v1427_v44, %v1426_v47  ;;  %v1418_v19 = vsub.f32 %v1380_v32, %v1408_v2  ;;  %v1433_v23 = vmul.f32 %v1416_v13, %v1416_v13  ;;  %v1419_v22 = vsub.f32 %v1381_v36, %v1408_v2 }
 0x66d   : > { %v1434_v24 = vmul.f32 %v1417_v20, %v1417_v20  ;;  %v1420_v28 = vsub.f32 %v1382_v39, %v1408_v2  ;;  %v1421_v33 = vsub.f32 %v1383_v52, %v1408_v2  ;;  %v1422_v35 = vsub.f32 %v1384_v54, %v1408_v2 }
 0x66e   : > { %v1443_v4 = vadd.f32 %v1442_v10, %v1428_v8  ;;  %v1435_v31 = vmul.f32 %v1418_v19, %v1418_v19  ;;  %v1436_v34 = vmul.f32 %v1419_v22, %v1419_v22  ;;  %v1423_v38 = vsub.f32 %v1385_v55, %v1408_v2 }
 0x66f   : > { %v1437_v37 = vmul.f32 %v1420_v28, %v1420_v28  ;;  %v1438_v27 = vmul.f32 %v1421_v33, %v1421_v33  ;;  %v1424_v50 = vsub.f32 %v1386_v57, %v1408_v2  ;;  %v1439_v32 = vmul.f32 %v1422_v35, %v1422_v35 }
 0x670   : > { %v1444_v11 = vadd.f32 %v1443_v4, %v1429_v15  ;;  %v1440_v53 = vmul.f32 %v1423_v38, %v1423_v38 }
 0x671   : > { %v1441_v48 = vmul.f32 %v1424_v50, %v1424_v50 }
 0x672   : > { %v1445_v17 = vadd.f32 %v1444_v11, %v1430_v9 }
 0x674   : > { %v1446_v18 = vadd.f32 %v1445_v17, %v1431_v14 }
 0x676   : > { %v1447_v30 = vadd.f32 %v1446_v18, %v1432_v25 }
 0x678   : > { %v1448_v26 = vadd.f32 %v1447_v30, %v1433_v23 }
 0x67a   : > { %v1449_v29 = vadd.f32 %v1448_v26, %v1434_v24 }
 0x67c   : > { %v1450_v16 = vadd.f32 %v1449_v29, %v1435_v31 }
 0x67e   : > { %v1451_v21 = vadd.f32 %v1450_v16, %v1436_v34 }
 0x680   : > { %v1452_v49 = vadd.f32 %v1451_v21, %v1437_v37 }
 0x682   : > { %v1453_v51 = vadd.f32 %v1452_v49, %v1438_v27 }
 0x684   : > { %v1454_v36 = vadd.f32 %v1453_v51, %v1439_v32 }
 0x686   : > { %v1455_v40 = vadd.f32 %v1454_v36, %v1440_v53 }
 0x688   : > { %v1456_v39 = vadd.f32 %v1455_v40, %v1441_v48 }
 0x68a   : > { %v1457_v42 = vrot.slane %v1456_v39, 4 }
 0x68c   : > { %v1458_v41 = vadd.f32 %v1457_v42, %v1456_v39 }
 0x68e   : > { %v1459_v52 = vrot.slane %v1458_v41, 2 }
 0x690   : > { %v1460_v43 = vadd.f32 %v1459_v52, %v1458_v41 }
 0x692   : > { %v1461_v56 = vrot.slane %v1460_v43, 1 }
 0x694   : > { %v1462_v54 = vadd.f32 %v1461_v56, %v1460_v43 }
 0x696   : > { %1463 = vst [vmem:[%s253_s25] sm:$0x1] %v1462_v54 }
 0x697 PF: > { %s16_s20 = sadd.s32 1, %s2118_s20   ;;  %s2435_s18 = smov %s2114_s19 }
 0x698   : > { %p13_p5 = scmp.ge.s32.totalorder %s16_s20, 4   ;;  %s2436_s19 = smov %s2438_s21 }
 0x69a   :  { %15 = sbr.rel (!%p13_p5) target bundleno = 2 (0x2), region = 95 }

</bundles_post_ra>
